<compile_context>
chip_gen: v6e
topology: v6e:2x2x1
jax: 0.10.0
libtpu: 0.0.40
codegen_flags: <defaults>
</compile_context>

<pallas_src>
import jax
import jax.numpy as jnp
from jax.experimental import pallas as pl
from jax.experimental.pallas import tpu as pltpu

NUM_H1 = 1024  # output features
NUM_H2 = 512   # input features


def _linear_kernel(x_ref, w_ref, b_ref, o_ref):
    # x: [tm, K], w: [K, N], b: [1, N] (row-broadcast), o: [tm, N]
    o_ref[...] = (
        jnp.dot(x_ref[...], w_ref[...], preferred_element_type=jnp.float32)
        + b_ref[...]
    ).astype(o_ref.dtype)


def linear_pallas(x, w_t, b2d, *, tm_max=256):
    """y = x @ w_t + b2d, with w_t = weight.T cached outside the hot path."""
    x = x.astype(jnp.float32)  # mirrors `x.float()` in the PyTorch module
    M, K = x.shape
    K2, N = w_t.shape
    assert K == K2 and b2d.shape == (1, N)

    # Small batch: one block covers everything (single grid step).
    # Large batch: tile M only (128 rows); weight/bias fully resident across
    # steps; N axis remains full-width -> lane-dense unmasked output stores.
    tm = M if M <= tm_max else 128
    grid = (pl.cdiv(M, tm),)

    return pl.pallas_call(
        _linear_kernel,
        out_shape=jax.ShapeDtypeStruct((M, N), jnp.float32),
        grid_spec=pltpu.PrefetchScalarGridSpec(
            num_scalar_prefetch=0,
            grid=grid,
            in_specs=[
                pl.BlockSpec((tm, K), lambda i: (i, 0)),   # x rows (tiled on M)
                pl.BlockSpec((K, N), lambda i: (0, 0)),    # full weight, resident
                pl.BlockSpec((1, N), lambda i: (0, 0)),    # full bias, resident
            ],
            out_specs=pl.BlockSpec((tm, N), lambda i: (i, 0)),
        ),
        compiler_params=pltpu.CompilerParams(
            dimension_semantics=("parallel",),  # M axis shardable across TCs (v7x)
        ),
    )(x, w_t, b2d)


class BackwardH2H1:
    """JAX/Pallas port of the PyTorch `backward_h2_h1` module."""

    def __init__(self, key):
        kw, kb = jax.random.split(key)
        # Deterministic init mimicking nn.Linear default: U(-1/sqrt(in), 1/sqrt(in))
        bound = 1.0 / jnp.sqrt(jnp.float32(NUM_H2))
        self.weight = jax.random.uniform(
            kw, (NUM_H1, NUM_H2), jnp.float32, minval=-bound, maxval=bound
        )
        self.bias = jax.random.uniform(
            kb, (NUM_H1,), jnp.float32, minval=-bound, maxval=bound
        )
        # Kernel-friendly layouts, computed ONCE (hoisted out of the hot path).
        self.w_t = jnp.asarray(self.weight.T)                 # [K, N]
        self.b2d = jnp.asarray(self.bias).reshape(1, NUM_H1)  # [1, N]

    def __call__(self, x):
        return linear_pallas(x, self.w_t, self.b2d)


if __name__ == "__main__":
    key = jax.random.PRNGKey(0)
    k_param, k_x = jax.random.split(key)

    model = BackwardH2H1(k_param)

    batch = 8
    x = jax.random.normal(k_x, (batch, NUM_H2), jnp.float32)

    y = model(x)
    y = jax.block_until_ready(y)

    # Sanity check against plain-JAX reference (nn.Linear semantics)
    y_ref = x @ model.weight.T + model.bias
    assert y.shape == (batch, NUM_H1)
    assert jnp.allclose(y, y_ref, atol=1e-4, rtol=1e-4)

    print("KERNEL_OK")
</pallas_src>

<mosaic_0001>
module attributes {stable_mosaic.version = 11 : i64} {
  func.func @_linear_kernel(%arg0: i32, %arg1: memref<8x512xf32, #tpu.memory_space<vmem>>, %arg2: memref<512x1024xf32, #tpu.memory_space<vmem>>, %arg3: memref<1x1024xf32, #tpu.memory_space<vmem>>, %arg4: memref<8x1024xf32, #tpu.memory_space<vmem>>) attributes {dimension_semantics = [#tpu.dimension_semantics<parallel>], iteration_bounds = array<i64: 1>, scalar_prefetch = 0 : i64, scratch_operands = 0 : i64, tpu.core_type = #tpu.core_type<tc>, window_params = [{transform_indices = @transform_0, window_bounds = array<i64: 8, 512>}, {pipeline_mode = #tpu.pipeline_mode<synchronous>, transform_indices = @transform_1, window_bounds = array<i64: 512, 1024>}, {pipeline_mode = #tpu.pipeline_mode<synchronous>, transform_indices = @transform_2, window_bounds = array<i64: 1, 1024>}, {transform_indices = @transform_3, window_bounds = array<i64: 8, 1024>}]} {
    %c0 = arith.constant 0 : index
    %c0_0 = arith.constant 0 : index
    %0 = vector.load %arg1[%c0, %c0_0] : memref<8x512xf32, #tpu.memory_space<vmem>>, vector<8x512xf32>
    %c0_1 = arith.constant 0 : index
    %c0_2 = arith.constant 0 : index
    %1 = vector.load %arg2[%c0_1, %c0_2] : memref<512x1024xf32, #tpu.memory_space<vmem>>, vector<512x1024xf32>
    %cst = arith.constant dense<0.000000e+00> : vector<8x1024xf32>
    %2 = tpu.matmul %0, %1, %cst {dimension_numbers = #tpu.dot_dimension_numbers<[1], [0], [0], [1], [0, 0, 1, 1], [], []>} : vector<8x512xf32>, vector<512x1024xf32>, vector<8x1024xf32> -> vector<8x1024xf32>
    %c0_3 = arith.constant 0 : index
    %c0_4 = arith.constant 0 : index
    %3 = vector.load %arg3[%c0_3, %c0_4] : memref<1x1024xf32, #tpu.memory_space<vmem>>, vector<1x1024xf32>
    %4 = vector.broadcast %3 : vector<1x1024xf32> to vector<8x1024xf32>
    %5 = arith.addf %2, %4 : vector<8x1024xf32>
    %c0_5 = arith.constant 0 : index
    %c0_6 = arith.constant 0 : index
    %6 = vector.load %arg4[%c0_5, %c0_6] : memref<8x1024xf32, #tpu.memory_space<vmem>>, vector<8x1024xf32>
    tpu.vector_store %arg4[%c0_5, %c0_6], %5 {strides = array<i32>} : memref<8x1024xf32, #tpu.memory_space<vmem>>, vector<8x1024xf32>,
    return
  }
  func.func @transform_0(%arg0: i32) -> (i32, i32) {
    %c0_i32 = arith.constant 0 : i32
    %c0_i32_0 = arith.constant 0 : i32
    return %arg0, %c0_i32 : i32, i32
  }
  func.func @transform_1(%arg0: i32) -> (i32, i32) {
    %c0_i32 = arith.constant 0 : i32
    %c0_i32_0 = arith.constant 0 : i32
    %c0_i32_1 = arith.constant 0 : i32
    return %c0_i32, %c0_i32_0 : i32, i32
  }
  func.func @transform_2(%arg0: i32) -> (i32, i32) {
    %c0_i32 = arith.constant 0 : i32
    %c0_i32_0 = arith.constant 0 : i32
    %c0_i32_1 = arith.constant 0 : i32
    return %c0_i32, %c0_i32_0 : i32, i32
  }
  func.func @transform_3(%arg0: i32) -> (i32, i32) {
    %c0_i32 = arith.constant 0 : i32
    %c0_i32_0 = arith.constant 0 : i32
    return %arg0, %c0_i32 : i32, i32
  }
}

</mosaic_0001>

<bundles_post_ra>
// kernel: tpu_custom_call.1
= control target key start
LH: loop header
LB: loop body
LE: loop exit
PB: predicated region body
PF: predicated region fallthrough
CT: control target
= control target key end

     0   :  { %8 = vsyncpa [#allocation3], 0  ;;  %s1388_s0 = inlined_call_operand.hbm [shape: f32[8,512], index: 0, kind: input, shape index: {}]   ;;  %s1389_s1 = inlined_call_operand.hbm [shape: f32[512,1024], index: 1, kind: input, shape index: {}]   ;;  %s1390_s2 = inlined_call_operand.hbm [shape: f32[1,1024], index: 2, kind: input, shape index: {}]   ;;  %s1391_s3 = inlined_call_operand.hbm [shape: f32[8,1024], index: 3, kind: output, shape index: {}]  }
   0x1   :  { %9 = vsyncpa [#allocation6], 0 }
   0x2   :  { %10 = vsyncpa [#allocation4], 0  ;;  %s1298_s12 = smov [#allocation5]  }
   0x3   :  { %s26_s13 = sshll.u32 %s1298_s12, 4  ;;  %s27_s13 = int_to_ptr.vmem [resolvable:$true] %s26_s13 }
   0x4   :  { %s1220_s14 = scalar_lea.vmem %s27_s13, 65536  ;;  %p1225_p1 = scmp.lt.s32.totalorder %s27_s13, %s27_s13 }
   0x5   :  { %p1221_p0 = scmp.ne.s32.totalorder %s27_s13, %s1220_s14  ;;  %p1226_p2 = scmp.lt.s32.totalorder %s1220_s14, %s1220_s14 }
   0x7   :  { %p1227_p3 = por %p1226_p2, %p1225_p1 }
   0x9   :  { %p1228_p4 = pnand %p1227_p3, %p1221_p0 }
   0xb   :  { %1231 = shalt.err (!%p1228_p4)
}
   0xc   :  { %s1299_s15 = smov 1024   ;;  %s1300_s16 = smov 64  }
   0xd   :  { %32 = dma.hbm_to_vmem [thread:$0]  %s1389_s1, 65536, %s27_s13, [#allocation6], %s1299_s15, %s1299_s15, %s1300_s16  }
   0xe   :  { %s1301_s19 = smov [#allocation2]   ;;  %s1302_s21 = smov [#allocation7]  }
   0xf   :  { %s17_s20 = sshll.u32 %s1301_s19, 4  ;;  %s39_s22 = sshll.u32 %s1302_s21, 4  ;;  %s18_s20 = int_to_ptr.vmem [resolvable:$true] %s17_s20  ;;  %s40_s22 = int_to_ptr.vmem [resolvable:$true] %s39_s22 }
  0x10   :  { %s1240_s23 = scalar_lea.vmem %s18_s20, 512  ;;  %p1245_p6 = scmp.lt.s32.totalorder %s18_s20, %s18_s20 }
  0x11   :  { %p1241_p5 = scmp.ne.s32.totalorder %s18_s20, %s1240_s23  ;;  %p1246_p7 = scmp.lt.s32.totalorder %s1240_s23, %s1240_s23 }
  0x13   :  { %p1247_p8 = por %p1246_p7, %p1245_p6 }
  0x15   :  { %p1248_p9 = pnand %p1247_p8, %p1241_p5 }
  0x17   :  { %1251 = shalt.err (!%p1248_p9)
}
  0x18   :  { %20 = dma.hbm_to_vmem [thread:$0]  %s1388_s0, 512, %s18_s20, [#allocation3]  }
  0x19   :  { %s1260_s26 = scalar_lea.vmem %s40_s22, 128  ;;  %p1265_p11 = scmp.lt.s32.totalorder %s40_s22, %s40_s22 }
  0x1a   :  { %p1261_p10 = scmp.ne.s32.totalorder %s40_s22, %s1260_s26  ;;  %p1266_p12 = scmp.lt.s32.totalorder %s1260_s26, %s1260_s26 }
  0x1c   :  { %p1267_p13 = por %p1266_p12, %p1265_p11 }
  0x1e   :  { %p1268_p0 = pnand %p1267_p13, %p1261_p10 }
  0x20   :  { %1271 = shalt.err (!%p1268_p0)
}
  0x21   :  { %42 = dma.hbm_to_vmem [thread:$0]  %s1390_s2, 128, %s40_s22, [#allocation6]  }
  0x22   :  { %1292 = dma.done.wait [#allocation3], 512  }
  0x23   :  { %1293 = vsyncadd [#allocation3], 4294966784 }
  0x24   :  { %1294 = dma.done.wait [#allocation6], 65664  }
  0x25   :  { %1295 = vsyncadd [#allocation6], 4294901632  ;;  %v177_v0 = vld [vmem:[#allocation5 + $0x3c8] sm:$0xff]  ;;  %v176_v2 = vld [vmem:[#allocation5 + $0x3c0] sm:$0xff]  ;;  %s1303_s0 = smov [#allocation8]  }
  0x26   :  { %v433_v1 = vld [vmem:[#allocation5 + $0xbc8] sm:$0xff]  ;;  %610 = vmatprep.subr.mxu0 %v177_v0  ;;  %v432_v3 = vld [vmem:[#allocation5 + $0xbc0] sm:$0xff]  ;;  %s1192_s2 = sshll.u32 %s1303_s0, 4  ;;  %s1193_s2 = int_to_ptr.vmem [resolvable:$true] %s1192_s2 }
  0x27   :  { %681 = vmatprep.subr.mxu1 %v433_v1  ;;  %v169_v4 = vld [vmem:[#allocation5 + $0x388] sm:$0xff]  ;;  %611 = vmatpush1.msra.mxu0 %v176_v2  ;;  %v168_v6 = vld [vmem:[#allocation5 + $0x380] sm:$0xff]  ;;  %s1272_s28 = scalar_lea.vmem %s1193_s2, 1024  ;;  %p1277_p2 = scmp.lt.s32.totalorder %s1193_s2, %s1193_s2 }
  0x28   :  { %v425_v5 = vld [vmem:[#allocation5 + $0xb88] sm:$0xff]  ;;  %682 = vmatpush1.msra.mxu1 %v432_v3  ;;  %v424_v7 = vld [vmem:[#allocation5 + $0xb80] sm:$0xff]  ;;  %612 = vmatprep.subr.mxu0 %v169_v4  ;;  %p1273_p1 = scmp.ne.s32.totalorder %s1193_s2, %s1272_s28  ;;  %p1278_p3 = scmp.lt.s32.totalorder %s1272_s28, %s1272_s28 }
  0x29   :  { %v161_v8 = vld [vmem:[#allocation5 + $0x348] sm:$0xff]  ;;  %683 = vmatprep.subr.mxu1 %v425_v5  ;;  %v160_v10 = vld [vmem:[#allocation5 + $0x340] sm:$0xff]  ;;  %613 = vmatpush1.msra.mxu0 %v168_v6 }
  0x2a   :  { %v417_v9 = vld [vmem:[#allocation5 + $0xb48] sm:$0xff]  ;;  %v416_v11 = vld [vmem:[#allocation5 + $0xb40] sm:$0xff]  ;;  %684 = vmatpush1.msra.mxu1 %v424_v7  ;;  %614 = vmatprep.subr.mxu0 %v161_v8  ;;  %p1279_p4 = por %p1278_p3, %p1277_p2 }
  0x2b   :  { %v153_v12 = vld [vmem:[#allocation5 + $0x308] sm:$0xff]  ;;  %685 = vmatprep.subr.mxu1 %v417_v9  ;;  %v152_v14 = vld [vmem:[#allocation5 + $0x300] sm:$0xff]  ;;  %615 = vmatpush1.msra.mxu0 %v160_v10 }
  0x2c   :  { %v409_v13 = vld [vmem:[#allocation5 + $0xb08] sm:$0xff]  ;;  %v408_v15 = vld [vmem:[#allocation5 + $0xb00] sm:$0xff]  ;;  %686 = vmatpush1.msra.mxu1 %v416_v11  ;;  %616 = vmatprep.subr.mxu0 %v153_v12  ;;  %p1280_p5 = pnand %p1279_p4, %p1273_p1 }
  0x2d   :  { %v145_v16 = vld [vmem:[#allocation5 + $0x2c8] sm:$0xff]  ;;  %687 = vmatprep.subr.mxu1 %v409_v13  ;;  %v144_v18 = vld [vmem:[#allocation5 + $0x2c0] sm:$0xff]  ;;  %617 = vmatpush1.msra.mxu0 %v152_v14 }
  0x2e   :  { %v401_v17 = vld [vmem:[#allocation5 + $0xac8] sm:$0xff]  ;;  %v400_v19 = vld [vmem:[#allocation5 + $0xac0] sm:$0xff]  ;;  %688 = vmatpush1.msra.mxu1 %v408_v15  ;;  %618 = vmatprep.subr.mxu0 %v145_v16 }
  0x2f   :  { %v137_v20 = vld [vmem:[#allocation5 + $0x288] sm:$0xff]  ;;  %689 = vmatprep.subr.mxu1 %v401_v17  ;;  %v136_v22 = vld [vmem:[#allocation5 + $0x280] sm:$0xff]  ;;  %619 = vmatpush1.msra.mxu0 %v144_v18 }
  0x30   :  { %v393_v21 = vld [vmem:[#allocation5 + $0xa88] sm:$0xff]  ;;  %v392_v23 = vld [vmem:[#allocation5 + $0xa80] sm:$0xff]  ;;  %690 = vmatpush1.msra.mxu1 %v400_v19  ;;  %620 = vmatprep.subr.mxu0 %v137_v20 }
  0x31   :  { %v129_v24 = vld [vmem:[#allocation5 + $0x248] sm:$0xff]  ;;  %691 = vmatprep.subr.mxu1 %v393_v21  ;;  %v128_v26 = vld [vmem:[#allocation5 + $0x240] sm:$0xff]  ;;  %621 = vmatpush1.msra.mxu0 %v136_v22 }
  0x32   :  { %v385_v25 = vld [vmem:[#allocation5 + $0xa48] sm:$0xff]  ;;  %v384_v27 = vld [vmem:[#allocation5 + $0xa40] sm:$0xff]  ;;  %692 = vmatpush1.msra.mxu1 %v392_v23  ;;  %622 = vmatprep.subr.mxu0 %v129_v24 }
  0x33   :  { %v121_v28 = vld [vmem:[#allocation5 + $0x208] sm:$0xff]  ;;  %693 = vmatprep.subr.mxu1 %v385_v25  ;;  %v120_v30 = vld [vmem:[#allocation5 + $0x200] sm:$0xff]  ;;  %623 = vmatpush1.msra.mxu0 %v128_v26 }
  0x34   :  { %v377_v29 = vld [vmem:[#allocation5 + $0xa08] sm:$0xff]  ;;  %v376_v31 = vld [vmem:[#allocation5 + $0xa00] sm:$0xff]  ;;  %694 = vmatpush1.msra.mxu1 %v384_v27  ;;  %624 = vmatprep.subr.mxu0 %v121_v28 }
  0x35   :  { %v113_v32 = vld [vmem:[#allocation5 + $0x1c8] sm:$0xff]  ;;  %695 = vmatprep.subr.mxu1 %v377_v29  ;;  %v112_v34 = vld [vmem:[#allocation5 + $0x1c0] sm:$0xff]  ;;  %625 = vmatpush1.msra.mxu0 %v120_v30 }
  0x36   :  { %v369_v33 = vld [vmem:[#allocation5 + $0x9c8] sm:$0xff]  ;;  %v368_v35 = vld [vmem:[#allocation5 + $0x9c0] sm:$0xff]  ;;  %696 = vmatpush1.msra.mxu1 %v376_v31  ;;  %626 = vmatprep.subr.mxu0 %v113_v32 }
  0x37   :  { %v105_v36 = vld [vmem:[#allocation5 + $0x188] sm:$0xff]  ;;  %697 = vmatprep.subr.mxu1 %v369_v33  ;;  %v104_v38 = vld [vmem:[#allocation5 + $0x180] sm:$0xff]  ;;  %627 = vmatpush1.msra.mxu0 %v112_v34 }
  0x38   :  { %v361_v37 = vld [vmem:[#allocation5 + $0x988] sm:$0xff]  ;;  %v360_v39 = vld [vmem:[#allocation5 + $0x980] sm:$0xff]  ;;  %698 = vmatpush1.msra.mxu1 %v368_v35  ;;  %628 = vmatprep.subr.mxu0 %v105_v36 }
  0x39   :  { %v97_v40 = vld [vmem:[#allocation5 + $0x148] sm:$0xff]  ;;  %699 = vmatprep.subr.mxu1 %v361_v37  ;;  %v96_v42 = vld [vmem:[#allocation5 + $0x140] sm:$0xff]  ;;  %629 = vmatpush1.msra.mxu0 %v104_v38 }
  0x3a   :  { %v353_v41 = vld [vmem:[#allocation5 + $0x948] sm:$0xff]  ;;  %v352_v43 = vld [vmem:[#allocation5 + $0x940] sm:$0xff]  ;;  %700 = vmatpush1.msra.mxu1 %v360_v39  ;;  %630 = vmatprep.subr.mxu0 %v97_v40 }
  0x3b   :  { %v89_v44 = vld [vmem:[#allocation5 + $0x108] sm:$0xff]  ;;  %701 = vmatprep.subr.mxu1 %v353_v41  ;;  %v88_v46 = vld [vmem:[#allocation5 + $0x100] sm:$0xff]  ;;  %631 = vmatpush1.msra.mxu0 %v96_v42 }
  0x3c   :  { %v345_v45 = vld [vmem:[#allocation5 + $0x908] sm:$0xff]  ;;  %v344_v47 = vld [vmem:[#allocation5 + $0x900] sm:$0xff]  ;;  %702 = vmatpush1.msra.mxu1 %v352_v43  ;;  %632 = vmatprep.subr.mxu0 %v89_v44 }
  0x3d   :  { %v81_v48 = vld [vmem:[#allocation5 + $0xc8] sm:$0xff]  ;;  %703 = vmatprep.subr.mxu1 %v345_v45  ;;  %v80_v50 = vld [vmem:[#allocation5 + $0xc0] sm:$0xff]  ;;  %633 = vmatpush1.msra.mxu0 %v88_v46 }
  0x3e   :  { %v337_v49 = vld [vmem:[#allocation5 + $0x8c8] sm:$0xff]  ;;  %v336_v51 = vld [vmem:[#allocation5 + $0x8c0] sm:$0xff]  ;;  %704 = vmatpush1.msra.mxu1 %v344_v47  ;;  %634 = vmatprep.subr.mxu0 %v81_v48 }
  0x3f   :  { %v73_v52 = vld [vmem:[#allocation5 + $0x88] sm:$0xff]  ;;  %705 = vmatprep.subr.mxu1 %v337_v49  ;;  %v72_v54 = vld [vmem:[#allocation5 + $0x80] sm:$0xff]  ;;  %635 = vmatpush1.msra.mxu0 %v80_v50 }
  0x40   :  { %v329_v53 = vld [vmem:[#allocation5 + $0x888] sm:$0xff]  ;;  %v328_v55 = vld [vmem:[#allocation5 + $0x880] sm:$0xff]  ;;  %706 = vmatpush1.msra.mxu1 %v336_v51  ;;  %636 = vmatprep.subr.mxu0 %v73_v52 }
  0x41   :  { %v65_v56 = vld [vmem:[#allocation5 + $0x48] sm:$0xff]  ;;  %707 = vmatprep.subr.mxu1 %v329_v53  ;;  %v64_v58 = vld [vmem:[#allocation5 + $0x40] sm:$0xff]  ;;  %637 = vmatpush1.msra.mxu0 %v72_v54 }
  0x42   :  { %v321_v57 = vld [vmem:[#allocation5 + $0x848] sm:$0xff]  ;;  %v320_v59 = vld [vmem:[#allocation5 + $0x840] sm:$0xff]  ;;  %708 = vmatpush1.msra.mxu1 %v328_v55  ;;  %638 = vmatprep.subr.mxu0 %v65_v56 }
  0x43   :  { %v57_v60 = vld [vmem:[#allocation5 + $0x8] sm:$0xff]  ;;  %709 = vmatprep.subr.mxu1 %v321_v57  ;;  %v56_v62 = vld [vmem:[#allocation5] sm:$0xff]  ;;  %639 = vmatpush1.msra.mxu0 %v64_v58 }
  0x44   :  { %v313_v61 = vld [vmem:[#allocation5 + $0x808] sm:$0xff]  ;;  %v312_v63 = vld [vmem:[#allocation5 + $0x800] sm:$0xff]  ;;  %710 = vmatpush1.msra.mxu1 %v320_v59  ;;  %640 = vmatprep.subr.mxu0 %v57_v60 }
  0x45   :  { %v305_v0 = vld [vmem:[#allocation5 + $0x7c8] sm:$0xff]  ;;  %711 = vmatprep.subr.mxu1 %v313_v61  ;;  %v304_v2 = vld [vmem:[#allocation5 + $0x7c0] sm:$0xff]  ;;  %641 = vmatpush1.msra.mxu0 %v56_v62 }
  0x46   :  { %v561_v1 = vld [vmem:[#allocation5 + $0xfc8] sm:$0xff]  ;;  %v560_v3 = vld [vmem:[#allocation5 + $0xfc0] sm:$0xff]  ;;  %712 = vmatpush1.msra.mxu1 %v312_v63  ;;  %642 = vmatprep.subr.mxu0 %v305_v0 }
  0x47   :  { %v297_v4 = vld [vmem:[#allocation5 + $0x788] sm:$0xff]  ;;  %713 = vmatprep.subr.mxu1 %v561_v1  ;;  %v296_v6 = vld [vmem:[#allocation5 + $0x780] sm:$0xff]  ;;  %643 = vmatpush2.msra.mxu0 %v304_v2  ;;  %v1337_v2 = vld [vmem:[#allocation2 + $0x18] sm:$0xff] }
  0x48   :  { %v553_v5 = vld [vmem:[#allocation5 + $0xf88] sm:$0xff]  ;;  %v552_v7 = vld [vmem:[#allocation5 + $0xf80] sm:$0xff]  ;;  %714 = vmatpush2.msra.mxu1 %v560_v3  ;;  %644 = vmatprep.subr.mxu0 %v297_v4  ;;  %v179_v3 = vld [vmem:[#allocation5 + $0x3d8] sm:$0xff] }
  0x49   :  { %v289_v8 = vld [vmem:[#allocation5 + $0x748] sm:$0xff]  ;;  %715 = vmatprep.subr.mxu1 %v553_v5  ;;  %v288_v10 = vld [vmem:[#allocation5 + $0x740] sm:$0xff]  ;;  %645 = vmatpush2.msra.mxu0 %v296_v6  ;;  %v435_v4 = vld [vmem:[#allocation5 + $0xbd8] sm:$0xff] }
  0x4a   :  { %v545_v9 = vld [vmem:[#allocation5 + $0xf48] sm:$0xff]  ;;  %v544_v11 = vld [vmem:[#allocation5 + $0xf40] sm:$0xff]  ;;  %716 = vmatpush2.msra.mxu1 %v552_v7  ;;  %646 = vmatprep.subr.mxu0 %v289_v8  ;;  %v1340_v5 = vld [vmem:[#allocation2 + $0x10] sm:$0xff] }
  0x4b   :  { %v281_v12 = vld [vmem:[#allocation5 + $0x708] sm:$0xff]  ;;  %717 = vmatprep.subr.mxu1 %v545_v9  ;;  %v280_v14 = vld [vmem:[#allocation5 + $0x700] sm:$0xff]  ;;  %647 = vmatpush2.msra.mxu0 %v288_v10  ;;  %v178_v6 = vld [vmem:[#allocation5 + $0x3d0] sm:$0xff] }
  0x4c   :  { %v537_v13 = vld [vmem:[#allocation5 + $0xf08] sm:$0xff]  ;;  %v536_v15 = vld [vmem:[#allocation5 + $0xf00] sm:$0xff]  ;;  %718 = vmatpush2.msra.mxu1 %v544_v11  ;;  %648 = vmatprep.subr.mxu0 %v281_v12  ;;  %v434_v7 = vld [vmem:[#allocation5 + $0xbd0] sm:$0xff] }
  0x4d   :  { %v273_v16 = vld [vmem:[#allocation5 + $0x6c8] sm:$0xff]  ;;  %719 = vmatprep.subr.mxu1 %v537_v13  ;;  %v272_v18 = vld [vmem:[#allocation5 + $0x6c0] sm:$0xff]  ;;  %649 = vmatpush2.msra.mxu0 %v280_v14  ;;  %v171_v8 = vld [vmem:[#allocation5 + $0x398] sm:$0xff] }
  0x4e   :  { %v529_v17 = vld [vmem:[#allocation5 + $0xec8] sm:$0xff]  ;;  %v528_v19 = vld [vmem:[#allocation5 + $0xec0] sm:$0xff]  ;;  %720 = vmatpush2.msra.mxu1 %v536_v15  ;;  %650 = vmatprep.subr.mxu0 %v273_v16  ;;  %v427_v9 = vld [vmem:[#allocation5 + $0xb98] sm:$0xff] }
  0x4f   :  { %v265_v20 = vld [vmem:[#allocation5 + $0x688] sm:$0xff]  ;;  %721 = vmatprep.subr.mxu1 %v529_v17  ;;  %v264_v22 = vld [vmem:[#allocation5 + $0x680] sm:$0xff]  ;;  %651 = vmatpush2.msra.mxu0 %v272_v18  ;;  %v170_v10 = vld [vmem:[#allocation5 + $0x390] sm:$0xff] }
  0x50   :  { %v521_v21 = vld [vmem:[#allocation5 + $0xe88] sm:$0xff]  ;;  %v520_v23 = vld [vmem:[#allocation5 + $0xe80] sm:$0xff]  ;;  %722 = vmatpush2.msra.mxu1 %v528_v19  ;;  %652 = vmatprep.subr.mxu0 %v265_v20  ;;  %v426_v11 = vld [vmem:[#allocation5 + $0xb90] sm:$0xff] }
  0x51   :  { %v257_v24 = vld [vmem:[#allocation5 + $0x648] sm:$0xff]  ;;  %723 = vmatprep.subr.mxu1 %v521_v21  ;;  %v256_v26 = vld [vmem:[#allocation5 + $0x640] sm:$0xff]  ;;  %653 = vmatpush2.msra.mxu0 %v264_v22  ;;  %v163_v12 = vld [vmem:[#allocation5 + $0x358] sm:$0xff] }
  0x52   :  { %v513_v25 = vld [vmem:[#allocation5 + $0xe48] sm:$0xff]  ;;  %v512_v27 = vld [vmem:[#allocation5 + $0xe40] sm:$0xff]  ;;  %724 = vmatpush2.msra.mxu1 %v520_v23  ;;  %654 = vmatprep.subr.mxu0 %v257_v24  ;;  %v419_v13 = vld [vmem:[#allocation5 + $0xb58] sm:$0xff] }
  0x53   :  { %v249_v28 = vld [vmem:[#allocation5 + $0x608] sm:$0xff]  ;;  %725 = vmatprep.subr.mxu1 %v513_v25  ;;  %v248_v30 = vld [vmem:[#allocation5 + $0x600] sm:$0xff]  ;;  %655 = vmatpush2.msra.mxu0 %v256_v26  ;;  %v162_v14 = vld [vmem:[#allocation5 + $0x350] sm:$0xff] }
  0x54   :  { %v505_v29 = vld [vmem:[#allocation5 + $0xe08] sm:$0xff]  ;;  %v504_v31 = vld [vmem:[#allocation5 + $0xe00] sm:$0xff]  ;;  %726 = vmatpush2.msra.mxu1 %v512_v27  ;;  %656 = vmatprep.subr.mxu0 %v249_v28  ;;  %v418_v15 = vld [vmem:[#allocation5 + $0xb50] sm:$0xff] }
  0x55   :  { %v241_v32 = vld [vmem:[#allocation5 + $0x5c8] sm:$0xff]  ;;  %727 = vmatprep.subr.mxu1 %v505_v29  ;;  %v240_v34 = vld [vmem:[#allocation5 + $0x5c0] sm:$0xff]  ;;  %657 = vmatpush2.msra.mxu0 %v248_v30  ;;  %v155_v16 = vld [vmem:[#allocation5 + $0x318] sm:$0xff] }
  0x56   :  { %v497_v33 = vld [vmem:[#allocation5 + $0xdc8] sm:$0xff]  ;;  %v496_v35 = vld [vmem:[#allocation5 + $0xdc0] sm:$0xff]  ;;  %728 = vmatpush2.msra.mxu1 %v504_v31  ;;  %658 = vmatprep.subr.mxu0 %v241_v32  ;;  %v411_v17 = vld [vmem:[#allocation5 + $0xb18] sm:$0xff] }
  0x57   :  { %v233_v36 = vld [vmem:[#allocation5 + $0x588] sm:$0xff]  ;;  %729 = vmatprep.subr.mxu1 %v497_v33  ;;  %v232_v38 = vld [vmem:[#allocation5 + $0x580] sm:$0xff]  ;;  %659 = vmatpush2.msra.mxu0 %v240_v34  ;;  %v154_v18 = vld [vmem:[#allocation5 + $0x310] sm:$0xff] }
  0x58   :  { %v489_v37 = vld [vmem:[#allocation5 + $0xd88] sm:$0xff]  ;;  %v488_v39 = vld [vmem:[#allocation5 + $0xd80] sm:$0xff]  ;;  %730 = vmatpush2.msra.mxu1 %v496_v35  ;;  %660 = vmatprep.subr.mxu0 %v233_v36  ;;  %v410_v19 = vld [vmem:[#allocation5 + $0xb10] sm:$0xff] }
  0x59   :  { %v225_v40 = vld [vmem:[#allocation5 + $0x548] sm:$0xff]  ;;  %731 = vmatprep.subr.mxu1 %v489_v37  ;;  %v224_v42 = vld [vmem:[#allocation5 + $0x540] sm:$0xff]  ;;  %661 = vmatpush2.msra.mxu0 %v232_v38  ;;  %v147_v20 = vld [vmem:[#allocation5 + $0x2d8] sm:$0xff] }
  0x5a   :  { %v481_v41 = vld [vmem:[#allocation5 + $0xd48] sm:$0xff]  ;;  %v480_v43 = vld [vmem:[#allocation5 + $0xd40] sm:$0xff]  ;;  %732 = vmatpush2.msra.mxu1 %v488_v39  ;;  %662 = vmatprep.subr.mxu0 %v225_v40  ;;  %v403_v21 = vld [vmem:[#allocation5 + $0xad8] sm:$0xff] }
  0x5b   :  { %v217_v44 = vld [vmem:[#allocation5 + $0x508] sm:$0xff]  ;;  %733 = vmatprep.subr.mxu1 %v481_v41  ;;  %v216_v46 = vld [vmem:[#allocation5 + $0x500] sm:$0xff]  ;;  %663 = vmatpush2.msra.mxu0 %v224_v42  ;;  %v146_v22 = vld [vmem:[#allocation5 + $0x2d0] sm:$0xff] }
  0x5c   :  { %v473_v45 = vld [vmem:[#allocation5 + $0xd08] sm:$0xff]  ;;  %v472_v47 = vld [vmem:[#allocation5 + $0xd00] sm:$0xff]  ;;  %734 = vmatpush2.msra.mxu1 %v480_v43  ;;  %664 = vmatprep.subr.mxu0 %v217_v44  ;;  %v402_v23 = vld [vmem:[#allocation5 + $0xad0] sm:$0xff] }
  0x5d   :  { %v209_v48 = vld [vmem:[#allocation5 + $0x4c8] sm:$0xff]  ;;  %735 = vmatprep.subr.mxu1 %v473_v45  ;;  %v208_v50 = vld [vmem:[#allocation5 + $0x4c0] sm:$0xff]  ;;  %665 = vmatpush2.msra.mxu0 %v216_v46  ;;  %v139_v24 = vld [vmem:[#allocation5 + $0x298] sm:$0xff] }
  0x5e   :  { %v465_v49 = vld [vmem:[#allocation5 + $0xcc8] sm:$0xff]  ;;  %v464_v51 = vld [vmem:[#allocation5 + $0xcc0] sm:$0xff]  ;;  %736 = vmatpush2.msra.mxu1 %v472_v47  ;;  %666 = vmatprep.subr.mxu0 %v209_v48  ;;  %v395_v25 = vld [vmem:[#allocation5 + $0xa98] sm:$0xff] }
  0x5f   :  { %v201_v52 = vld [vmem:[#allocation5 + $0x488] sm:$0xff]  ;;  %737 = vmatprep.subr.mxu1 %v465_v49  ;;  %v200_v54 = vld [vmem:[#allocation5 + $0x480] sm:$0xff]  ;;  %667 = vmatpush2.msra.mxu0 %v208_v50  ;;  %v138_v26 = vld [vmem:[#allocation5 + $0x290] sm:$0xff] }
  0x60   :  { %v457_v53 = vld [vmem:[#allocation5 + $0xc88] sm:$0xff]  ;;  %v456_v55 = vld [vmem:[#allocation5 + $0xc80] sm:$0xff]  ;;  %738 = vmatpush2.msra.mxu1 %v464_v51  ;;  %668 = vmatprep.subr.mxu0 %v201_v52  ;;  %v394_v27 = vld [vmem:[#allocation5 + $0xa90] sm:$0xff] }
  0x61   :  { %v193_v56 = vld [vmem:[#allocation5 + $0x448] sm:$0xff]  ;;  %739 = vmatprep.subr.mxu1 %v457_v53  ;;  %v192_v58 = vld [vmem:[#allocation5 + $0x440] sm:$0xff]  ;;  %669 = vmatpush2.msra.mxu0 %v200_v54  ;;  %v131_v28 = vld [vmem:[#allocation5 + $0x258] sm:$0xff] }
  0x62   :  { %v449_v57 = vld [vmem:[#allocation5 + $0xc48] sm:$0xff]  ;;  %v448_v59 = vld [vmem:[#allocation5 + $0xc40] sm:$0xff]  ;;  %740 = vmatpush2.msra.mxu1 %v456_v55  ;;  %670 = vmatprep.subr.mxu0 %v193_v56  ;;  %v387_v29 = vld [vmem:[#allocation5 + $0xa58] sm:$0xff] }
  0x63   :  { %v185_v60 = vld [vmem:[#allocation5 + $0x408] sm:$0xff]  ;;  %741 = vmatprep.subr.mxu1 %v449_v57  ;;  %v184_v62 = vld [vmem:[#allocation5 + $0x400] sm:$0xff]  ;;  %671 = vmatpush2.msra.mxu0 %v192_v58  ;;  %v130_v30 = vld [vmem:[#allocation5 + $0x250] sm:$0xff] }
  0x64   :  { %v441_v61 = vld [vmem:[#allocation5 + $0xc08] sm:$0xff]  ;;  %742 = vmatpush2.msra.mxu1 %v448_v59  ;;  %v440_v0 = vld [vmem:[#allocation5 + $0xc00] sm:$0xff]  ;;  %672 = vmatprep.subr.mxu0 %v185_v60  ;;  %v386_v31 = vld [vmem:[#allocation5 + $0xa50] sm:$0xff] }
  0x65   :  { %v1333_v63 = vld [vmem:[#allocation2 + $0x8] sm:$0xff]  ;;  %v1335_v1 = vld [vmem:[#allocation2] sm:$0xff]  ;;  %743 = vmatprep.subr.mxu1 %v441_v61  ;;  %673 = vmatpush2.msra.mxu0 %v184_v62  ;;  %v123_v32 = vld [vmem:[#allocation5 + $0x218] sm:$0xff] }
  0x66   :  { %674 = vmatprep.mubr.f32.mxu0 %v1333_v63  ;;  %744 = vmatpush2.msra.mxu1 %v440_v0  ;;  %v379_v33 = vld [vmem:[#allocation5 + $0xa18] sm:$0xff]  ;;  %v122_v34 = vld [vmem:[#allocation5 + $0x210] sm:$0xff] }
  0x67   :  { %675 = vmatmul.mubr.f32.vlgmr.msra.gmra.mxu0 %v1335_v1  ;;  %745 = vmatprep.mubr.f32.mxu1 %v1337_v2  ;;  %v378_v35 = vld [vmem:[#allocation5 + $0xa10] sm:$0xff]  ;;  %v115_v36 = vld [vmem:[#allocation5 + $0x1d8] sm:$0xff] }
  0x68   :  { %752 = vmatprep.subr.mxu0 %v179_v3  ;;  %823 = vmatprep.subr.mxu1 %v435_v4  ;;  %v371_v37 = vld [vmem:[#allocation5 + $0x9d8] sm:$0xff]  ;;  %v114_v38 = vld [vmem:[#allocation5 + $0x1d0] sm:$0xff] }
  0x69   :  { %746 = vmatmul.mubr.f32.vlgmr.msra.gmra.mxu1 %v1340_v5  ;;  %753 = vmatpush1.msra.mxu0 %v178_v6  ;;  %v370_v39 = vld [vmem:[#allocation5 + $0x9d0] sm:$0xff]  ;;  %v107_v40 = vld [vmem:[#allocation5 + $0x198] sm:$0xff] }
  0x6a   :  { %824 = vmatpush1.msra.mxu1 %v434_v7  ;;  %754 = vmatprep.subr.mxu0 %v171_v8  ;;  %v363_v41 = vld [vmem:[#allocation5 + $0x998] sm:$0xff]  ;;  %v106_v42 = vld [vmem:[#allocation5 + $0x190] sm:$0xff] }
  0x6b   :  { %825 = vmatprep.subr.mxu1 %v427_v9  ;;  %755 = vmatpush1.msra.mxu0 %v170_v10  ;;  %v362_v43 = vld [vmem:[#allocation5 + $0x990] sm:$0xff]  ;;  %v99_v44 = vld [vmem:[#allocation5 + $0x158] sm:$0xff] }
  0x6c   :  { %826 = vmatpush1.msra.mxu1 %v426_v11  ;;  %756 = vmatprep.subr.mxu0 %v163_v12  ;;  %v355_v45 = vld [vmem:[#allocation5 + $0x958] sm:$0xff]  ;;  %v98_v46 = vld [vmem:[#allocation5 + $0x150] sm:$0xff] }
  0x6d   :  { %827 = vmatprep.subr.mxu1 %v419_v13  ;;  %757 = vmatpush1.msra.mxu0 %v162_v14  ;;  %v354_v47 = vld [vmem:[#allocation5 + $0x950] sm:$0xff]  ;;  %v91_v48 = vld [vmem:[#allocation5 + $0x118] sm:$0xff] }
  0x6e   :  { %828 = vmatpush1.msra.mxu1 %v418_v15  ;;  %758 = vmatprep.subr.mxu0 %v155_v16  ;;  %v347_v49 = vld [vmem:[#allocation5 + $0x918] sm:$0xff]  ;;  %v90_v50 = vld [vmem:[#allocation5 + $0x110] sm:$0xff] }
  0x6f   :  { %829 = vmatprep.subr.mxu1 %v411_v17  ;;  %759 = vmatpush1.msra.mxu0 %v154_v18  ;;  %v346_v51 = vld [vmem:[#allocation5 + $0x910] sm:$0xff]  ;;  %v83_v52 = vld [vmem:[#allocation5 + $0xd8] sm:$0xff] }
  0x70   :  { %830 = vmatpush1.msra.mxu1 %v410_v19  ;;  %760 = vmatprep.subr.mxu0 %v147_v20  ;;  %v339_v53 = vld [vmem:[#allocation5 + $0x8d8] sm:$0xff]  ;;  %v82_v54 = vld [vmem:[#allocation5 + $0xd0] sm:$0xff] }
  0x71   :  { %831 = vmatprep.subr.mxu1 %v403_v21  ;;  %761 = vmatpush1.msra.mxu0 %v146_v22  ;;  %v338_v55 = vld [vmem:[#allocation5 + $0x8d0] sm:$0xff]  ;;  %v75_v56 = vld [vmem:[#allocation5 + $0x98] sm:$0xff] }
  0x72   :  { %832 = vmatpush1.msra.mxu1 %v402_v23  ;;  %762 = vmatprep.subr.mxu0 %v139_v24  ;;  %v331_v57 = vld [vmem:[#allocation5 + $0x898] sm:$0xff]  ;;  %v74_v58 = vld [vmem:[#allocation5 + $0x90] sm:$0xff] }
  0x73   :  { %833 = vmatprep.subr.mxu1 %v395_v25  ;;  %763 = vmatpush1.msra.mxu0 %v138_v26  ;;  %v330_v59 = vld [vmem:[#allocation5 + $0x890] sm:$0xff]  ;;  %v67_v60 = vld [vmem:[#allocation5 + $0x58] sm:$0xff] }
  0x74   :  { %834 = vmatpush1.msra.mxu1 %v394_v27  ;;  %764 = vmatprep.subr.mxu0 %v131_v28  ;;  %v323_v61 = vld [vmem:[#allocation5 + $0x858] sm:$0xff]  ;;  %v66_v62 = vld [vmem:[#allocation5 + $0x50] sm:$0xff] }
  0x75   :  { %835 = vmatprep.subr.mxu1 %v387_v29  ;;  %765 = vmatpush1.msra.mxu0 %v130_v30  ;;  %v322_v0 = vld [vmem:[#allocation5 + $0x850] sm:$0xff]  ;;  %v59_v3 = vld [vmem:[#allocation5 + $0x18] sm:$0xff] }
  0x76   :  { %836 = vmatpush1.msra.mxu1 %v386_v31  ;;  %766 = vmatprep.subr.mxu0 %v123_v32  ;;  %v315_v4 = vld [vmem:[#allocation5 + $0x818] sm:$0xff]  ;;  %v58_v6 = vld [vmem:[#allocation5 + $0x10] sm:$0xff] }
  0x77   :  { %837 = vmatprep.subr.mxu1 %v379_v33  ;;  %767 = vmatpush1.msra.mxu0 %v122_v34  ;;  %v314_v7 = vld [vmem:[#allocation5 + $0x810] sm:$0xff]  ;;  %v307_v8 = vld [vmem:[#allocation5 + $0x7d8] sm:$0xff] }
  0x78   :  { %838 = vmatpush1.msra.mxu1 %v378_v35  ;;  %768 = vmatprep.subr.mxu0 %v115_v36  ;;  %v563_v9 = vld [vmem:[#allocation5 + $0xfd8] sm:$0xff]  ;;  %v306_v10 = vld [vmem:[#allocation5 + $0x7d0] sm:$0xff] }
  0x79   :  { %839 = vmatprep.subr.mxu1 %v371_v37  ;;  %769 = vmatpush1.msra.mxu0 %v114_v38  ;;  %v562_v11 = vld [vmem:[#allocation5 + $0xfd0] sm:$0xff]  ;;  %v299_v12 = vld [vmem:[#allocation5 + $0x798] sm:$0xff] }
  0x7a   :  { %840 = vmatpush1.msra.mxu1 %v370_v39  ;;  %770 = vmatprep.subr.mxu0 %v107_v40  ;;  %v555_v13 = vld [vmem:[#allocation5 + $0xf98] sm:$0xff]  ;;  %v298_v14 = vld [vmem:[#allocation5 + $0x790] sm:$0xff] }
  0x7b   :  { %841 = vmatprep.subr.mxu1 %v363_v41  ;;  %771 = vmatpush1.msra.mxu0 %v106_v42  ;;  %v554_v15 = vld [vmem:[#allocation5 + $0xf90] sm:$0xff]  ;;  %v291_v16 = vld [vmem:[#allocation5 + $0x758] sm:$0xff] }
  0x7c   :  { %842 = vmatpush1.msra.mxu1 %v362_v43  ;;  %772 = vmatprep.subr.mxu0 %v99_v44  ;;  %v547_v17 = vld [vmem:[#allocation5 + $0xf58] sm:$0xff]  ;;  %v290_v18 = vld [vmem:[#allocation5 + $0x750] sm:$0xff] }
  0x7d   :  { %843 = vmatprep.subr.mxu1 %v355_v45  ;;  %773 = vmatpush1.msra.mxu0 %v98_v46  ;;  %v546_v19 = vld [vmem:[#allocation5 + $0xf50] sm:$0xff]  ;;  %v283_v20 = vld [vmem:[#allocation5 + $0x718] sm:$0xff] }
  0x7e   :  { %844 = vmatpush1.msra.mxu1 %v354_v47  ;;  %774 = vmatprep.subr.mxu0 %v91_v48  ;;  %v539_v21 = vld [vmem:[#allocation5 + $0xf18] sm:$0xff]  ;;  %v282_v22 = vld [vmem:[#allocation5 + $0x710] sm:$0xff] }
  0x7f   :  { %845 = vmatprep.subr.mxu1 %v347_v49  ;;  %775 = vmatpush1.msra.mxu0 %v90_v50  ;;  %v538_v23 = vld [vmem:[#allocation5 + $0xf10] sm:$0xff]  ;;  %v275_v24 = vld [vmem:[#allocation5 + $0x6d8] sm:$0xff] }
  0x80   :  { %846 = vmatpush1.msra.mxu1 %v346_v51  ;;  %776 = vmatprep.subr.mxu0 %v83_v52  ;;  %v531_v25 = vld [vmem:[#allocation5 + $0xed8] sm:$0xff]  ;;  %v274_v26 = vld [vmem:[#allocation5 + $0x6d0] sm:$0xff] }
  0x81   :  { %847 = vmatprep.subr.mxu1 %v339_v53  ;;  %777 = vmatpush1.msra.mxu0 %v82_v54  ;;  %v530_v27 = vld [vmem:[#allocation5 + $0xed0] sm:$0xff]  ;;  %v267_v28 = vld [vmem:[#allocation5 + $0x698] sm:$0xff] }
  0x82   :  { %848 = vmatpush1.msra.mxu1 %v338_v55  ;;  %778 = vmatprep.subr.mxu0 %v75_v56  ;;  %v523_v29 = vld [vmem:[#allocation5 + $0xe98] sm:$0xff]  ;;  %v266_v30 = vld [vmem:[#allocation5 + $0x690] sm:$0xff] }
  0x83   :  { %849 = vmatprep.subr.mxu1 %v331_v57  ;;  %779 = vmatpush1.msra.mxu0 %v74_v58  ;;  %v522_v31 = vld [vmem:[#allocation5 + $0xe90] sm:$0xff]  ;;  %v259_v32 = vld [vmem:[#allocation5 + $0x658] sm:$0xff] }
  0x84   :  { %850 = vmatpush1.msra.mxu1 %v330_v59  ;;  %780 = vmatprep.subr.mxu0 %v67_v60  ;;  %v515_v33 = vld [vmem:[#allocation5 + $0xe58] sm:$0xff]  ;;  %v258_v34 = vld [vmem:[#allocation5 + $0x650] sm:$0xff] }
  0x85   :  { %851 = vmatprep.subr.mxu1 %v323_v61  ;;  %781 = vmatpush1.msra.mxu0 %v66_v62  ;;  %v514_v35 = vld [vmem:[#allocation5 + $0xe50] sm:$0xff]  ;;  %v251_v36 = vld [vmem:[#allocation5 + $0x618] sm:$0xff] }
  0x86   :  { %852 = vmatpush1.msra.mxu1 %v322_v0  ;;  %782 = vmatprep.subr.mxu0 %v59_v3  ;;  %v507_v37 = vld [vmem:[#allocation5 + $0xe18] sm:$0xff]  ;;  %v250_v38 = vld [vmem:[#allocation5 + $0x610] sm:$0xff] }
  0x87   :  { %853 = vmatprep.subr.mxu1 %v315_v4  ;;  %783 = vmatpush1.msra.mxu0 %v58_v6  ;;  %v506_v39 = vld [vmem:[#allocation5 + $0xe10] sm:$0xff]  ;;  %v243_v40 = vld [vmem:[#allocation5 + $0x5d8] sm:$0xff] }
  0x88   :  { %854 = vmatpush1.msra.mxu1 %v314_v7  ;;  %784 = vmatprep.subr.mxu0 %v307_v8  ;;  %v499_v41 = vld [vmem:[#allocation5 + $0xdd8] sm:$0xff]  ;;  %v242_v42 = vld [vmem:[#allocation5 + $0x5d0] sm:$0xff] }
  0x89   :  { %855 = vmatprep.subr.mxu1 %v563_v9  ;;  %785 = vmatpush2.msra.mxu0 %v306_v10  ;;  %v498_v43 = vld [vmem:[#allocation5 + $0xdd0] sm:$0xff]  ;;  %v235_v44 = vld [vmem:[#allocation5 + $0x598] sm:$0xff] }
  0x8a   :  { %856 = vmatpush2.msra.mxu1 %v562_v11  ;;  %786 = vmatprep.subr.mxu0 %v299_v12  ;;  %v491_v45 = vld [vmem:[#allocation5 + $0xd98] sm:$0xff]  ;;  %v234_v46 = vld [vmem:[#allocation5 + $0x590] sm:$0xff]  ;;  %v181_v12 = vld [vmem:[#allocation5 + $0x3e8] sm:$0xff] }
  0x8b   :  { %857 = vmatprep.subr.mxu1 %v555_v13  ;;  %787 = vmatpush2.msra.mxu0 %v298_v14  ;;  %v490_v47 = vld [vmem:[#allocation5 + $0xd90] sm:$0xff]  ;;  %v227_v48 = vld [vmem:[#allocation5 + $0x558] sm:$0xff]  ;;  %v437_v13 = vld [vmem:[#allocation5 + $0xbe8] sm:$0xff] }
  0x8c   :  { %858 = vmatpush2.msra.mxu1 %v554_v15  ;;  %788 = vmatprep.subr.mxu0 %v291_v16  ;;  %v483_v49 = vld [vmem:[#allocation5 + $0xd58] sm:$0xff]  ;;  %v226_v50 = vld [vmem:[#allocation5 + $0x550] sm:$0xff]  ;;  %v180_v14 = vld [vmem:[#allocation5 + $0x3e0] sm:$0xff] }
  0x8d   :  { %859 = vmatprep.subr.mxu1 %v547_v17  ;;  %789 = vmatpush2.msra.mxu0 %v290_v18  ;;  %v482_v51 = vld [vmem:[#allocation5 + $0xd50] sm:$0xff]  ;;  %v219_v52 = vld [vmem:[#allocation5 + $0x518] sm:$0xff]  ;;  %v436_v15 = vld [vmem:[#allocation5 + $0xbe0] sm:$0xff] }
  0x8e   :  { %860 = vmatpush2.msra.mxu1 %v546_v19  ;;  %790 = vmatprep.subr.mxu0 %v283_v20  ;;  %v475_v53 = vld [vmem:[#allocation5 + $0xd18] sm:$0xff]  ;;  %v218_v54 = vld [vmem:[#allocation5 + $0x510] sm:$0xff]  ;;  %v173_v16 = vld [vmem:[#allocation5 + $0x3a8] sm:$0xff] }
  0x8f   :  { %861 = vmatprep.subr.mxu1 %v539_v21  ;;  %791 = vmatpush2.msra.mxu0 %v282_v22  ;;  %v474_v55 = vld [vmem:[#allocation5 + $0xd10] sm:$0xff]  ;;  %v211_v56 = vld [vmem:[#allocation5 + $0x4d8] sm:$0xff]  ;;  %v429_v17 = vld [vmem:[#allocation5 + $0xba8] sm:$0xff] }
  0x90   :  { %862 = vmatpush2.msra.mxu1 %v538_v23  ;;  %792 = vmatprep.subr.mxu0 %v275_v24  ;;  %v467_v57 = vld [vmem:[#allocation5 + $0xcd8] sm:$0xff]  ;;  %v210_v58 = vld [vmem:[#allocation5 + $0x4d0] sm:$0xff]  ;;  %v172_v18 = vld [vmem:[#allocation5 + $0x3a0] sm:$0xff] }
  0x91   :  { %863 = vmatprep.subr.mxu1 %v531_v25  ;;  %793 = vmatpush2.msra.mxu0 %v274_v26  ;;  %v466_v59 = vld [vmem:[#allocation5 + $0xcd0] sm:$0xff]  ;;  %v203_v60 = vld [vmem:[#allocation5 + $0x498] sm:$0xff]  ;;  %v428_v19 = vld [vmem:[#allocation5 + $0xba0] sm:$0xff] }
  0x92   :  { %864 = vmatpush2.msra.mxu1 %v530_v27  ;;  %794 = vmatprep.subr.mxu0 %v267_v28  ;;  %v459_v61 = vld [vmem:[#allocation5 + $0xc98] sm:$0xff]  ;;  %v202_v62 = vld [vmem:[#allocation5 + $0x490] sm:$0xff]  ;;  %v165_v20 = vld [vmem:[#allocation5 + $0x368] sm:$0xff] }
  0x93   :  { %865 = vmatprep.subr.mxu1 %v523_v29  ;;  %795 = vmatpush2.msra.mxu0 %v266_v30  ;;  %v458_v0 = vld [vmem:[#allocation5 + $0xc90] sm:$0xff]  ;;  %v195_v3 = vld [vmem:[#allocation5 + $0x458] sm:$0xff]  ;;  %v164_v21 = vld [vmem:[#allocation5 + $0x360] sm:$0xff] }
  0x94   :  { %866 = vmatpush2.msra.mxu1 %v522_v31  ;;  %796 = vmatprep.subr.mxu0 %v259_v32  ;;  %v451_v4 = vld [vmem:[#allocation5 + $0xc58] sm:$0xff]  ;;  %v194_v6 = vld [vmem:[#allocation5 + $0x450] sm:$0xff]  ;;  %v157_v22 = vld [vmem:[#allocation5 + $0x328] sm:$0xff] }
  0x95   :  { %867 = vmatprep.subr.mxu1 %v515_v33  ;;  %797 = vmatpush2.msra.mxu0 %v258_v34  ;;  %v450_v7 = vld [vmem:[#allocation5 + $0xc50] sm:$0xff]  ;;  %v187_v8 = vld [vmem:[#allocation5 + $0x418] sm:$0xff]  ;;  %v156_v23 = vld [vmem:[#allocation5 + $0x320] sm:$0xff] }
  0x96   :  { %868 = vmatpush2.msra.mxu1 %v514_v35  ;;  %798 = vmatprep.subr.mxu0 %v251_v36  ;;  %v443_v9 = vld [vmem:[#allocation5 + $0xc18] sm:$0xff]  ;;  %v186_v10 = vld [vmem:[#allocation5 + $0x410] sm:$0xff]  ;;  %v412_v24 = vld [vmem:[#allocation5 + $0xb20] sm:$0xff] }
  0x97   :  { %869 = vmatprep.subr.mxu1 %v507_v37  ;;  %799 = vmatpush2.msra.mxu0 %v250_v38  ;;  %v442_v11 = vld [vmem:[#allocation5 + $0xc10] sm:$0xff]  ;;  %v405_v25 = vld [vmem:[#allocation5 + $0xae8] sm:$0xff]  ;;  %v148_v26 = vld [vmem:[#allocation5 + $0x2e0] sm:$0xff] }
  0x98   :  { %870 = vmatpush2.msra.mxu1 %v506_v39  ;;  %800 = vmatprep.subr.mxu0 %v243_v40  ;;  %v404_v27 = vld [vmem:[#allocation5 + $0xae0] sm:$0xff]  ;;  %v141_v28 = vld [vmem:[#allocation5 + $0x2a8] sm:$0xff] }
  0x99   :  { %871 = vmatprep.subr.mxu1 %v499_v41  ;;  %801 = vmatpush2.msra.mxu0 %v242_v42  ;;  %v397_v29 = vld [vmem:[#allocation5 + $0xaa8] sm:$0xff]  ;;  %v140_v30 = vld [vmem:[#allocation5 + $0x2a0] sm:$0xff] }
  0x9a   :  { %872 = vmatpush2.msra.mxu1 %v498_v43  ;;  %802 = vmatprep.subr.mxu0 %v235_v44  ;;  %v396_v31 = vld [vmem:[#allocation5 + $0xaa0] sm:$0xff]  ;;  %v133_v32 = vld [vmem:[#allocation5 + $0x268] sm:$0xff] }
  0x9b   :  { %873 = vmatprep.subr.mxu1 %v491_v45  ;;  %803 = vmatpush2.msra.mxu0 %v234_v46  ;;  %v389_v33 = vld [vmem:[#allocation5 + $0xa68] sm:$0xff]  ;;  %v132_v34 = vld [vmem:[#allocation5 + $0x260] sm:$0xff] }
  0x9c   :  { %874 = vmatpush2.msra.mxu1 %v490_v47  ;;  %804 = vmatprep.subr.mxu0 %v227_v48  ;;  %v388_v35 = vld [vmem:[#allocation5 + $0xa60] sm:$0xff]  ;;  %v125_v36 = vld [vmem:[#allocation5 + $0x228] sm:$0xff] }
  0x9d   :  { %875 = vmatprep.subr.mxu1 %v483_v49  ;;  %805 = vmatpush2.msra.mxu0 %v226_v50  ;;  %v381_v37 = vld [vmem:[#allocation5 + $0xa28] sm:$0xff]  ;;  %v124_v38 = vld [vmem:[#allocation5 + $0x220] sm:$0xff] }
  0x9e   :  { %876 = vmatpush2.msra.mxu1 %v482_v51  ;;  %806 = vmatprep.subr.mxu0 %v219_v52  ;;  %v380_v39 = vld [vmem:[#allocation5 + $0xa20] sm:$0xff]  ;;  %v117_v40 = vld [vmem:[#allocation5 + $0x1e8] sm:$0xff] }
  0x9f   :  { %877 = vmatprep.subr.mxu1 %v475_v53  ;;  %807 = vmatpush2.msra.mxu0 %v218_v54  ;;  %v373_v41 = vld [vmem:[#allocation5 + $0x9e8] sm:$0xff]  ;;  %v116_v42 = vld [vmem:[#allocation5 + $0x1e0] sm:$0xff] }
  0xa0   :  { %878 = vmatpush2.msra.mxu1 %v474_v55  ;;  %808 = vmatprep.subr.mxu0 %v211_v56  ;;  %v372_v43 = vld [vmem:[#allocation5 + $0x9e0] sm:$0xff]  ;;  %v109_v44 = vld [vmem:[#allocation5 + $0x1a8] sm:$0xff] }
  0xa1   :  { %879 = vmatprep.subr.mxu1 %v467_v57  ;;  %809 = vmatpush2.msra.mxu0 %v210_v58  ;;  %v365_v45 = vld [vmem:[#allocation5 + $0x9a8] sm:$0xff]  ;;  %v108_v46 = vld [vmem:[#allocation5 + $0x1a0] sm:$0xff] }
  0xa2   :  { %880 = vmatpush2.msra.mxu1 %v466_v59  ;;  %810 = vmatprep.subr.mxu0 %v203_v60  ;;  %v364_v47 = vld [vmem:[#allocation5 + $0x9a0] sm:$0xff]  ;;  %v101_v48 = vld [vmem:[#allocation5 + $0x168] sm:$0xff] }
  0xa3   :  { %881 = vmatprep.subr.mxu1 %v459_v61  ;;  %811 = vmatpush2.msra.mxu0 %v202_v62  ;;  %v357_v49 = vld [vmem:[#allocation5 + $0x968] sm:$0xff]  ;;  %v100_v50 = vld [vmem:[#allocation5 + $0x160] sm:$0xff] }
  0xa4   :  { %882 = vmatpush2.msra.mxu1 %v458_v0  ;;  %812 = vmatprep.subr.mxu0 %v195_v3  ;;  %v356_v51 = vld [vmem:[#allocation5 + $0x960] sm:$0xff]  ;;  %v93_v52 = vld [vmem:[#allocation5 + $0x128] sm:$0xff] }
  0xa5   :  { %883 = vmatprep.subr.mxu1 %v451_v4  ;;  %813 = vmatpush2.msra.mxu0 %v194_v6  ;;  %v349_v53 = vld [vmem:[#allocation5 + $0x928] sm:$0xff]  ;;  %v92_v54 = vld [vmem:[#allocation5 + $0x120] sm:$0xff] }
  0xa6   :  { %884 = vmatpush2.msra.mxu1 %v450_v7  ;;  %814 = vmatprep.subr.mxu0 %v187_v8  ;;  %v348_v55 = vld [vmem:[#allocation5 + $0x920] sm:$0xff]  ;;  %v85_v56 = vld [vmem:[#allocation5 + $0xe8] sm:$0xff] }
  0xa7   :  { %885 = vmatprep.subr.mxu1 %v443_v9  ;;  %815 = vmatpush2.msra.mxu0 %v186_v10  ;;  %v341_v57 = vld [vmem:[#allocation5 + $0x8e8] sm:$0xff]  ;;  %v84_v58 = vld [vmem:[#allocation5 + $0xe0] sm:$0xff] }
  0xa8   :  { %816 = vmatprep.mubr.f32.mxu0 %v1333_v63  ;;  %886 = vmatpush2.msra.mxu1 %v442_v11  ;;  %v421_v63 = vld [vmem:[#allocation5 + $0xb68] sm:$0xff]  ;;  %v340_v59 = vld [vmem:[#allocation5 + $0x8e0] sm:$0xff] }
  0xa9   :  { %817 = vmatmul.mubr.f32.vlgmr.msra.gmra.mxu0 %v1335_v1  ;;  %887 = vmatprep.mubr.f32.mxu1 %v1337_v2  ;;  %v420_v1 = vld [vmem:[#allocation5 + $0xb60] sm:$0xff]  ;;  %v413_v2 = vld [vmem:[#allocation5 + $0xb28] sm:$0xff] }
  0xaa   :  { %894 = vmatprep.subr.mxu0 %v181_v12  ;;  %965 = vmatprep.subr.mxu1 %v437_v13  ;;  %v77_v60 = vld [vmem:[#allocation5 + $0xa8] sm:$0xff]  ;;  %v76_v62 = vld [vmem:[#allocation5 + $0xa0] sm:$0xff] }
  0xab   :  { %888 = vmatmul.mubr.f32.vlgmr.msra.gmra.mxu1 %v1340_v5  ;;  %895 = vmatpush1.msra.mxu0 %v180_v14  ;;  %v149_v5 = vld [vmem:[#allocation5 + $0x2e8] sm:$0xff]  ;;  %v332_v0 = vld [vmem:[#allocation5 + $0x8a0] sm:$0xff] }
  0xac   :  { %966 = vmatpush1.msra.mxu1 %v436_v15  ;;  %896 = vmatprep.subr.mxu0 %v173_v16  ;;  %v333_v61 = vld [vmem:[#allocation5 + $0x8a8] sm:$0xff]  ;;  %v68_v6 = vld [vmem:[#allocation5 + $0x60] sm:$0xff] }
  0xad   :  { %967 = vmatprep.subr.mxu1 %v429_v17  ;;  %897 = vmatpush1.msra.mxu0 %v172_v18  ;;  %v69_v3 = vld [vmem:[#allocation5 + $0x68] sm:$0xff]  ;;  %v324_v7 = vld [vmem:[#allocation5 + $0x860] sm:$0xff] }
  0xae   :  { %968 = vmatpush1.msra.mxu1 %v428_v19  ;;  %898 = vmatprep.subr.mxu0 %v165_v20  ;;  %v325_v4 = vld [vmem:[#allocation5 + $0x868] sm:$0xff]  ;;  %v60_v10 = vld [vmem:[#allocation5 + $0x20] sm:$0xff] }
  0xaf   :  { %969 = vmatprep.subr.mxu1 %v421_v63  ;;  %899 = vmatpush1.msra.mxu0 %v164_v21  ;;  %v61_v8 = vld [vmem:[#allocation5 + $0x28] sm:$0xff]  ;;  %v316_v11 = vld [vmem:[#allocation5 + $0x820] sm:$0xff] }
  0xb0   :  { %970 = vmatpush1.msra.mxu1 %v420_v1  ;;  %900 = vmatprep.subr.mxu0 %v157_v22  ;;  %v317_v9 = vld [vmem:[#allocation5 + $0x828] sm:$0xff]  ;;  %v308_v14 = vld [vmem:[#allocation5 + $0x7e0] sm:$0xff] }
  0xb1   :  { %971 = vmatprep.subr.mxu1 %v413_v2  ;;  %901 = vmatpush1.msra.mxu0 %v156_v23  ;;  %v309_v12 = vld [vmem:[#allocation5 + $0x7e8] sm:$0xff]  ;;  %v564_v15 = vld [vmem:[#allocation5 + $0xfe0] sm:$0xff] }
  0xb2   :  { %972 = vmatpush1.msra.mxu1 %v412_v24  ;;  %902 = vmatprep.subr.mxu0 %v149_v5  ;;  %v565_v13 = vld [vmem:[#allocation5 + $0xfe8] sm:$0xff]  ;;  %v300_v18 = vld [vmem:[#allocation5 + $0x7a0] sm:$0xff] }
  0xb3   :  { %973 = vmatprep.subr.mxu1 %v405_v25  ;;  %903 = vmatpush1.msra.mxu0 %v148_v26  ;;  %v301_v16 = vld [vmem:[#allocation5 + $0x7a8] sm:$0xff]  ;;  %v556_v19 = vld [vmem:[#allocation5 + $0xfa0] sm:$0xff] }
  0xb4   :  { %974 = vmatpush1.msra.mxu1 %v404_v27  ;;  %904 = vmatprep.subr.mxu0 %v141_v28  ;;  %v557_v17 = vld [vmem:[#allocation5 + $0xfa8] sm:$0xff]  ;;  %v292_v21 = vld [vmem:[#allocation5 + $0x760] sm:$0xff] }
  0xb5   :  { %975 = vmatprep.subr.mxu1 %v397_v29  ;;  %905 = vmatpush1.msra.mxu0 %v140_v30  ;;  %v293_v20 = vld [vmem:[#allocation5 + $0x768] sm:$0xff]  ;;  %v548_v1 = vld [vmem:[#allocation5 + $0xf60] sm:$0xff] }
  0xb6   :  { %976 = vmatpush1.msra.mxu1 %v396_v31  ;;  %906 = vmatprep.subr.mxu0 %v133_v32  ;;  %v549_v63 = vld [vmem:[#allocation5 + $0xf68] sm:$0xff]  ;;  %v284_v23 = vld [vmem:[#allocation5 + $0x720] sm:$0xff] }
  0xb7   :  { %977 = vmatprep.subr.mxu1 %v389_v33  ;;  %907 = vmatpush1.msra.mxu0 %v132_v34  ;;  %v285_v22 = vld [vmem:[#allocation5 + $0x728] sm:$0xff]  ;;  %v540_v24 = vld [vmem:[#allocation5 + $0xf20] sm:$0xff] }
  0xb8   :  { %978 = vmatpush1.msra.mxu1 %v388_v35  ;;  %908 = vmatprep.subr.mxu0 %v125_v36  ;;  %v541_v2 = vld [vmem:[#allocation5 + $0xf28] sm:$0xff]  ;;  %v276_v26 = vld [vmem:[#allocation5 + $0x6e0] sm:$0xff] }
  0xb9   :  { %979 = vmatprep.subr.mxu1 %v381_v37  ;;  %909 = vmatpush1.msra.mxu0 %v124_v38  ;;  %v277_v5 = vld [vmem:[#allocation5 + $0x6e8] sm:$0xff]  ;;  %v532_v27 = vld [vmem:[#allocation5 + $0xee0] sm:$0xff] }
  0xba   :  { %980 = vmatpush1.msra.mxu1 %v380_v39  ;;  %910 = vmatprep.subr.mxu0 %v117_v40  ;;  %v533_v25 = vld [vmem:[#allocation5 + $0xee8] sm:$0xff]  ;;  %v268_v30 = vld [vmem:[#allocation5 + $0x6a0] sm:$0xff] }
  0xbb   :  { %981 = vmatprep.subr.mxu1 %v373_v41  ;;  %911 = vmatpush1.msra.mxu0 %v116_v42  ;;  %v269_v28 = vld [vmem:[#allocation5 + $0x6a8] sm:$0xff]  ;;  %v524_v31 = vld [vmem:[#allocation5 + $0xea0] sm:$0xff] }
  0xbc   :  { %982 = vmatpush1.msra.mxu1 %v372_v43  ;;  %912 = vmatprep.subr.mxu0 %v109_v44  ;;  %v525_v29 = vld [vmem:[#allocation5 + $0xea8] sm:$0xff]  ;;  %v260_v34 = vld [vmem:[#allocation5 + $0x660] sm:$0xff] }
  0xbd   :  { %983 = vmatprep.subr.mxu1 %v365_v45  ;;  %913 = vmatpush1.msra.mxu0 %v108_v46  ;;  %v261_v32 = vld [vmem:[#allocation5 + $0x668] sm:$0xff]  ;;  %v516_v35 = vld [vmem:[#allocation5 + $0xe60] sm:$0xff] }
  0xbe   :  { %984 = vmatpush1.msra.mxu1 %v364_v47  ;;  %914 = vmatprep.subr.mxu0 %v101_v48  ;;  %v517_v33 = vld [vmem:[#allocation5 + $0xe68] sm:$0xff]  ;;  %v252_v38 = vld [vmem:[#allocation5 + $0x620] sm:$0xff] }
  0xbf   :  { %985 = vmatprep.subr.mxu1 %v357_v49  ;;  %915 = vmatpush1.msra.mxu0 %v100_v50  ;;  %v253_v36 = vld [vmem:[#allocation5 + $0x628] sm:$0xff]  ;;  %v508_v39 = vld [vmem:[#allocation5 + $0xe20] sm:$0xff] }
  0xc0   :  { %986 = vmatpush1.msra.mxu1 %v356_v51  ;;  %916 = vmatprep.subr.mxu0 %v93_v52  ;;  %v509_v37 = vld [vmem:[#allocation5 + $0xe28] sm:$0xff]  ;;  %v244_v42 = vld [vmem:[#allocation5 + $0x5e0] sm:$0xff] }
  0xc1   :  { %987 = vmatprep.subr.mxu1 %v349_v53  ;;  %917 = vmatpush1.msra.mxu0 %v92_v54  ;;  %v245_v40 = vld [vmem:[#allocation5 + $0x5e8] sm:$0xff]  ;;  %v500_v43 = vld [vmem:[#allocation5 + $0xde0] sm:$0xff] }
  0xc2   :  { %988 = vmatpush1.msra.mxu1 %v348_v55  ;;  %918 = vmatprep.subr.mxu0 %v85_v56  ;;  %v501_v41 = vld [vmem:[#allocation5 + $0xde8] sm:$0xff]  ;;  %v236_v46 = vld [vmem:[#allocation5 + $0x5a0] sm:$0xff] }
  0xc3   :  { %989 = vmatprep.subr.mxu1 %v341_v57  ;;  %919 = vmatpush1.msra.mxu0 %v84_v58  ;;  %v237_v44 = vld [vmem:[#allocation5 + $0x5a8] sm:$0xff]  ;;  %v492_v47 = vld [vmem:[#allocation5 + $0xda0] sm:$0xff] }
  0xc4   :  { %990 = vmatpush1.msra.mxu1 %v340_v59  ;;  %920 = vmatprep.subr.mxu0 %v77_v60  ;;  %v493_v45 = vld [vmem:[#allocation5 + $0xda8] sm:$0xff]  ;;  %v228_v50 = vld [vmem:[#allocation5 + $0x560] sm:$0xff] }
  0xc5   :  { %991 = vmatprep.subr.mxu1 %v333_v61  ;;  %921 = vmatpush1.msra.mxu0 %v76_v62  ;;  %v229_v48 = vld [vmem:[#allocation5 + $0x568] sm:$0xff]  ;;  %v484_v51 = vld [vmem:[#allocation5 + $0xd60] sm:$0xff] }
  0xc6   :  { %992 = vmatpush1.msra.mxu1 %v332_v0  ;;  %922 = vmatprep.subr.mxu0 %v69_v3  ;;  %v485_v49 = vld [vmem:[#allocation5 + $0xd68] sm:$0xff]  ;;  %v220_v54 = vld [vmem:[#allocation5 + $0x520] sm:$0xff] }
  0xc7   :  { %993 = vmatprep.subr.mxu1 %v325_v4  ;;  %923 = vmatpush1.msra.mxu0 %v68_v6  ;;  %v221_v52 = vld [vmem:[#allocation5 + $0x528] sm:$0xff]  ;;  %v476_v55 = vld [vmem:[#allocation5 + $0xd20] sm:$0xff] }
  0xc8   :  { %994 = vmatpush1.msra.mxu1 %v324_v7  ;;  %924 = vmatprep.subr.mxu0 %v61_v8  ;;  %v477_v53 = vld [vmem:[#allocation5 + $0xd28] sm:$0xff]  ;;  %v212_v58 = vld [vmem:[#allocation5 + $0x4e0] sm:$0xff] }
  0xc9   :  { %995 = vmatprep.subr.mxu1 %v317_v9  ;;  %925 = vmatpush1.msra.mxu0 %v60_v10  ;;  %v213_v56 = vld [vmem:[#allocation5 + $0x4e8] sm:$0xff]  ;;  %v468_v59 = vld [vmem:[#allocation5 + $0xce0] sm:$0xff] }
  0xca   :  { %996 = vmatpush1.msra.mxu1 %v316_v11  ;;  %926 = vmatprep.subr.mxu0 %v309_v12  ;;  %v469_v57 = vld [vmem:[#allocation5 + $0xce8] sm:$0xff]  ;;  %v204_v62 = vld [vmem:[#allocation5 + $0x4a0] sm:$0xff]  ;;  %v183_v12 = vld [vmem:[#allocation5 + $0x3f8] sm:$0xff] }
  0xcb   :  { %997 = vmatprep.subr.mxu1 %v565_v13  ;;  %927 = vmatpush2.msra.mxu0 %v308_v14  ;;  %v205_v60 = vld [vmem:[#allocation5 + $0x4a8] sm:$0xff]  ;;  %v460_v0 = vld [vmem:[#allocation5 + $0xca0] sm:$0xff]  ;;  %v439_v14 = vld [vmem:[#allocation5 + $0xbf8] sm:$0xff] }
  0xcc   :  { %998 = vmatpush2.msra.mxu1 %v564_v15  ;;  %928 = vmatprep.subr.mxu0 %v301_v16  ;;  %v461_v61 = vld [vmem:[#allocation5 + $0xca8] sm:$0xff]  ;;  %v196_v6 = vld [vmem:[#allocation5 + $0x460] sm:$0xff]  ;;  %v182_v16 = vld [vmem:[#allocation5 + $0x3f0] sm:$0xff] }
  0xcd   :  { %999 = vmatprep.subr.mxu1 %v557_v17  ;;  %929 = vmatpush2.msra.mxu0 %v300_v18  ;;  %v197_v3 = vld [vmem:[#allocation5 + $0x468] sm:$0xff]  ;;  %v452_v7 = vld [vmem:[#allocation5 + $0xc60] sm:$0xff]  ;;  %v438_v17 = vld [vmem:[#allocation5 + $0xbf0] sm:$0xff] }
  0xce   :  { %1000 = vmatpush2.msra.mxu1 %v556_v19  ;;  %930 = vmatprep.subr.mxu0 %v293_v20  ;;  %v453_v4 = vld [vmem:[#allocation5 + $0xc68] sm:$0xff]  ;;  %v188_v10 = vld [vmem:[#allocation5 + $0x420] sm:$0xff]  ;;  %v1355_v18 = vld [vmem:[#allocation2 + $0x18] sm:$0xff] }
  0xcf   :  { %1001 = vmatprep.subr.mxu1 %v549_v63  ;;  %931 = vmatpush2.msra.mxu0 %v292_v21  ;;  %v189_v8 = vld [vmem:[#allocation5 + $0x428] sm:$0xff]  ;;  %v444_v11 = vld [vmem:[#allocation5 + $0xc20] sm:$0xff]  ;;  %v175_v19 = vld [vmem:[#allocation5 + $0x3b8] sm:$0xff] }
  0xd0   :  { %1002 = vmatpush2.msra.mxu1 %v548_v1  ;;  %932 = vmatprep.subr.mxu0 %v285_v22  ;;  %v445_v9 = vld [vmem:[#allocation5 + $0xc28] sm:$0xff]  ;;  %v1352_v15 = vld [vmem:[#allocation2] sm:$0xff]  ;;  %v431_v20 = vld [vmem:[#allocation5 + $0xbb8] sm:$0xff] }
  0xd1   :  { %1003 = vmatprep.subr.mxu1 %v541_v2  ;;  %933 = vmatpush2.msra.mxu0 %v284_v23  ;;  %v1349_v13 = vld [vmem:[#allocation2 + $0x8] sm:$0xff]  ;;  %v1358_v63 = vld [vmem:[#allocation2 + $0x10] sm:$0xff]  ;;  %v167_v22 = vld [vmem:[#allocation5 + $0x378] sm:$0xff] }
  0xd2   :  { %1004 = vmatpush2.msra.mxu1 %v540_v24  ;;  %934 = vmatprep.subr.mxu0 %v277_v5  ;;  %v174_v21 = vld [vmem:[#allocation5 + $0x3b0] sm:$0xff]  ;;  %v423_v2 = vld [vmem:[#allocation5 + $0xb78] sm:$0xff] }
  0xd3   :  { %1005 = vmatprep.subr.mxu1 %v533_v25  ;;  %935 = vmatpush2.msra.mxu0 %v276_v26  ;;  %v430_v1 = vld [vmem:[#allocation5 + $0xbb0] sm:$0xff]  ;;  %v159_v5 = vld [vmem:[#allocation5 + $0x338] sm:$0xff] }
  0xd4   :  { %1006 = vmatpush2.msra.mxu1 %v532_v27  ;;  %936 = vmatprep.subr.mxu0 %v269_v28  ;;  %v166_v23 = vld [vmem:[#allocation5 + $0x370] sm:$0xff]  ;;  %v415_v25 = vld [vmem:[#allocation5 + $0xb38] sm:$0xff] }
  0xd5   :  { %1007 = vmatprep.subr.mxu1 %v525_v29  ;;  %937 = vmatpush2.msra.mxu0 %v268_v30  ;;  %v422_v24 = vld [vmem:[#allocation5 + $0xb70] sm:$0xff]  ;;  %v151_v28 = vld [vmem:[#allocation5 + $0x2f8] sm:$0xff] }
  0xd6   :  { %1008 = vmatpush2.msra.mxu1 %v524_v31  ;;  %938 = vmatprep.subr.mxu0 %v261_v32  ;;  %v158_v26 = vld [vmem:[#allocation5 + $0x330] sm:$0xff]  ;;  %v407_v29 = vld [vmem:[#allocation5 + $0xaf8] sm:$0xff] }
  0xd7   :  { %1009 = vmatprep.subr.mxu1 %v517_v33  ;;  %939 = vmatpush2.msra.mxu0 %v260_v34  ;;  %v414_v27 = vld [vmem:[#allocation5 + $0xb30] sm:$0xff]  ;;  %v143_v32 = vld [vmem:[#allocation5 + $0x2b8] sm:$0xff] }
  0xd8   :  { %1010 = vmatpush2.msra.mxu1 %v516_v35  ;;  %940 = vmatprep.subr.mxu0 %v253_v36  ;;  %v150_v30 = vld [vmem:[#allocation5 + $0x2f0] sm:$0xff]  ;;  %v399_v33 = vld [vmem:[#allocation5 + $0xab8] sm:$0xff] }
  0xd9   :  { %1011 = vmatprep.subr.mxu1 %v509_v37  ;;  %941 = vmatpush2.msra.mxu0 %v252_v38  ;;  %v406_v31 = vld [vmem:[#allocation5 + $0xaf0] sm:$0xff]  ;;  %v135_v36 = vld [vmem:[#allocation5 + $0x278] sm:$0xff] }
  0xda   :  { %1012 = vmatpush2.msra.mxu1 %v508_v39  ;;  %942 = vmatprep.subr.mxu0 %v245_v40  ;;  %v142_v34 = vld [vmem:[#allocation5 + $0x2b0] sm:$0xff]  ;;  %v391_v37 = vld [vmem:[#allocation5 + $0xa78] sm:$0xff] }
  0xdb   :  { %1013 = vmatprep.subr.mxu1 %v501_v41  ;;  %943 = vmatpush2.msra.mxu0 %v244_v42  ;;  %v398_v35 = vld [vmem:[#allocation5 + $0xab0] sm:$0xff]  ;;  %v127_v40 = vld [vmem:[#allocation5 + $0x238] sm:$0xff] }
  0xdc   :  { %1014 = vmatpush2.msra.mxu1 %v500_v43  ;;  %944 = vmatprep.subr.mxu0 %v237_v44  ;;  %v134_v38 = vld [vmem:[#allocation5 + $0x270] sm:$0xff]  ;;  %v383_v41 = vld [vmem:[#allocation5 + $0xa38] sm:$0xff] }
  0xdd   :  { %1015 = vmatprep.subr.mxu1 %v493_v45  ;;  %945 = vmatpush2.msra.mxu0 %v236_v46  ;;  %v390_v39 = vld [vmem:[#allocation5 + $0xa70] sm:$0xff]  ;;  %v119_v44 = vld [vmem:[#allocation5 + $0x1f8] sm:$0xff] }
  0xde   :  { %1016 = vmatpush2.msra.mxu1 %v492_v47  ;;  %946 = vmatprep.subr.mxu0 %v229_v48  ;;  %v126_v42 = vld [vmem:[#allocation5 + $0x230] sm:$0xff]  ;;  %v375_v45 = vld [vmem:[#allocation5 + $0x9f8] sm:$0xff] }
  0xdf   :  { %1017 = vmatprep.subr.mxu1 %v485_v49  ;;  %947 = vmatpush2.msra.mxu0 %v228_v50  ;;  %v382_v43 = vld [vmem:[#allocation5 + $0xa30] sm:$0xff]  ;;  %v111_v48 = vld [vmem:[#allocation5 + $0x1b8] sm:$0xff] }
  0xe0   :  { %1018 = vmatpush2.msra.mxu1 %v484_v51  ;;  %948 = vmatprep.subr.mxu0 %v221_v52  ;;  %v118_v46 = vld [vmem:[#allocation5 + $0x1f0] sm:$0xff]  ;;  %v367_v49 = vld [vmem:[#allocation5 + $0x9b8] sm:$0xff] }
  0xe1   :  { %1019 = vmatprep.subr.mxu1 %v477_v53  ;;  %949 = vmatpush2.msra.mxu0 %v220_v54  ;;  %v374_v47 = vld [vmem:[#allocation5 + $0x9f0] sm:$0xff]  ;;  %v103_v52 = vld [vmem:[#allocation5 + $0x178] sm:$0xff] }
  0xe2   :  { %1020 = vmatpush2.msra.mxu1 %v476_v55  ;;  %950 = vmatprep.subr.mxu0 %v213_v56  ;;  %v110_v50 = vld [vmem:[#allocation5 + $0x1b0] sm:$0xff]  ;;  %v359_v53 = vld [vmem:[#allocation5 + $0x978] sm:$0xff] }
  0xe3   :  { %1021 = vmatprep.subr.mxu1 %v469_v57  ;;  %951 = vmatpush2.msra.mxu0 %v212_v58  ;;  %v366_v51 = vld [vmem:[#allocation5 + $0x9b0] sm:$0xff]  ;;  %v95_v56 = vld [vmem:[#allocation5 + $0x138] sm:$0xff] }
  0xe4   :  { %1022 = vmatpush2.msra.mxu1 %v468_v59  ;;  %952 = vmatprep.subr.mxu0 %v205_v60  ;;  %v102_v54 = vld [vmem:[#allocation5 + $0x170] sm:$0xff]  ;;  %v351_v57 = vld [vmem:[#allocation5 + $0x938] sm:$0xff] }
  0xe5   :  { %1023 = vmatprep.subr.mxu1 %v461_v61  ;;  %953 = vmatpush2.msra.mxu0 %v204_v62  ;;  %v358_v55 = vld [vmem:[#allocation5 + $0x970] sm:$0xff]  ;;  %v87_v60 = vld [vmem:[#allocation5 + $0xf8] sm:$0xff] }
  0xe6   :  { %1024 = vmatpush2.msra.mxu1 %v460_v0  ;;  %954 = vmatprep.subr.mxu0 %v197_v3  ;;  %v94_v58 = vld [vmem:[#allocation5 + $0x130] sm:$0xff]  ;;  %v343_v61 = vld [vmem:[#allocation5 + $0x8f8] sm:$0xff] }
  0xe7   :  { %1025 = vmatprep.subr.mxu1 %v453_v4  ;;  %955 = vmatpush2.msra.mxu0 %v196_v6  ;;  %v350_v59 = vld [vmem:[#allocation5 + $0x930] sm:$0xff]  ;;  %v79_v3 = vld [vmem:[#allocation5 + $0xb8] sm:$0xff] }
  0xe8   :  { %1026 = vmatpush2.msra.mxu1 %v452_v7  ;;  %956 = vmatprep.subr.mxu0 %v189_v8  ;;  %v86_v62 = vld [vmem:[#allocation5 + $0xf0] sm:$0xff]  ;;  %v335_v4 = vld [vmem:[#allocation5 + $0x8b8] sm:$0xff] }
  0xe9   :  { %1027 = vmatprep.subr.mxu1 %v445_v9  ;;  %957 = vmatpush2.msra.mxu0 %v188_v10  ;;  %v342_v0 = vld [vmem:[#allocation5 + $0x8f0] sm:$0xff]  ;;  %v71_v8 = vld [vmem:[#allocation5 + $0x78] sm:$0xff] }
  0xea   :  { %958 = vmatprep.mubr.f32.mxu0 %v1349_v13  ;;  %1028 = vmatpush2.msra.mxu1 %v444_v11  ;;  %v78_v6 = vld [vmem:[#allocation5 + $0xb0] sm:$0xff]  ;;  %v327_v9 = vld [vmem:[#allocation5 + $0x878] sm:$0xff] }
  0xeb   :  { %959 = vmatmul.mubr.f32.vlgmr.msra.gmra.mxu0 %v1352_v15  ;;  %1029 = vmatprep.mubr.f32.mxu1 %v1355_v18  ;;  %v334_v7 = vld [vmem:[#allocation5 + $0x8b0] sm:$0xff] }
  0xec   :  { %1036 = vmatprep.subr.mxu0 %v183_v12  ;;  %1107 = vmatprep.subr.mxu1 %v439_v14  ;;  %v70_v10 = vld [vmem:[#allocation5 + $0x70] sm:$0xff]  ;;  %v63_v12 = vld [vmem:[#allocation5 + $0x38] sm:$0xff] }
  0xed   :  { %1030 = vmatmul.mubr.f32.vlgmr.msra.gmra.mxu1 %v1358_v63  ;;  %1037 = vmatpush1.msra.mxu0 %v182_v16  ;;  %v326_v11 = vld [vmem:[#allocation5 + $0x870] sm:$0xff]  ;;  %v319_v14 = vld [vmem:[#allocation5 + $0x838] sm:$0xff] }
  0xee   :  { %1108 = vmatpush1.msra.mxu1 %v438_v17  ;;  %1038 = vmatprep.subr.mxu0 %v175_v19  ;;  %v62_v16 = vld [vmem:[#allocation5 + $0x30] sm:$0xff]  ;;  %v311_v19 = vld [vmem:[#allocation5 + $0x7f8] sm:$0xff] }
  0xef   :  { %1109 = vmatprep.subr.mxu1 %v431_v20  ;;  %1039 = vmatpush1.msra.mxu0 %v174_v21  ;;  %v318_v17 = vld [vmem:[#allocation5 + $0x830] sm:$0xff]  ;;  %v567_v20 = vld [vmem:[#allocation5 + $0xff8] sm:$0xff] }
  0xf0   :  { %1110 = vmatpush1.msra.mxu1 %v430_v1  ;;  %1040 = vmatprep.subr.mxu0 %v167_v22  ;;  %v310_v21 = vld [vmem:[#allocation5 + $0x7f0] sm:$0xff]  ;;  %v303_v22 = vld [vmem:[#allocation5 + $0x7b8] sm:$0xff] }
  0xf1   :  { %1111 = vmatprep.subr.mxu1 %v423_v2  ;;  %1041 = vmatpush1.msra.mxu0 %v166_v23  ;;  %v566_v1 = vld [vmem:[#allocation5 + $0xff0] sm:$0xff]  ;;  %v559_v2 = vld [vmem:[#allocation5 + $0xfb8] sm:$0xff] }
  0xf2   :  { %1112 = vmatpush1.msra.mxu1 %v422_v24  ;;  %1042 = vmatprep.subr.mxu0 %v159_v5  ;;  %v302_v23 = vld [vmem:[#allocation5 + $0x7b0] sm:$0xff]  ;;  %v295_v5 = vld [vmem:[#allocation5 + $0x778] sm:$0xff] }
  0xf3   :  { %1113 = vmatprep.subr.mxu1 %v415_v25  ;;  %1043 = vmatpush1.msra.mxu0 %v158_v26  ;;  %v558_v24 = vld [vmem:[#allocation5 + $0xfb0] sm:$0xff]  ;;  %v551_v25 = vld [vmem:[#allocation5 + $0xf78] sm:$0xff] }
  0xf4   :  { %1114 = vmatpush1.msra.mxu1 %v414_v27  ;;  %1044 = vmatprep.subr.mxu0 %v151_v28  ;;  %v294_v26 = vld [vmem:[#allocation5 + $0x770] sm:$0xff]  ;;  %v287_v28 = vld [vmem:[#allocation5 + $0x738] sm:$0xff] }
  0xf5   :  { %1115 = vmatprep.subr.mxu1 %v407_v29  ;;  %1045 = vmatpush1.msra.mxu0 %v150_v30  ;;  %v550_v27 = vld [vmem:[#allocation5 + $0xf70] sm:$0xff]  ;;  %v543_v29 = vld [vmem:[#allocation5 + $0xf38] sm:$0xff] }
  0xf6   :  { %1116 = vmatpush1.msra.mxu1 %v406_v31  ;;  %1046 = vmatprep.subr.mxu0 %v143_v32  ;;  %v286_v30 = vld [vmem:[#allocation5 + $0x730] sm:$0xff]  ;;  %v279_v32 = vld [vmem:[#allocation5 + $0x6f8] sm:$0xff] }
  0xf7   :  { %1117 = vmatprep.subr.mxu1 %v399_v33  ;;  %1047 = vmatpush1.msra.mxu0 %v142_v34  ;;  %v542_v31 = vld [vmem:[#allocation5 + $0xf30] sm:$0xff]  ;;  %v535_v33 = vld [vmem:[#allocation5 + $0xef8] sm:$0xff] }
  0xf8   :  { %1118 = vmatpush1.msra.mxu1 %v398_v35  ;;  %1048 = vmatprep.subr.mxu0 %v135_v36  ;;  %v278_v34 = vld [vmem:[#allocation5 + $0x6f0] sm:$0xff]  ;;  %v271_v36 = vld [vmem:[#allocation5 + $0x6b8] sm:$0xff] }
  0xf9   :  { %1119 = vmatprep.subr.mxu1 %v391_v37  ;;  %1049 = vmatpush1.msra.mxu0 %v134_v38  ;;  %v534_v35 = vld [vmem:[#allocation5 + $0xef0] sm:$0xff]  ;;  %v527_v37 = vld [vmem:[#allocation5 + $0xeb8] sm:$0xff] }
  0xfa   :  { %1120 = vmatpush1.msra.mxu1 %v390_v39  ;;  %1050 = vmatprep.subr.mxu0 %v127_v40  ;;  %v270_v38 = vld [vmem:[#allocation5 + $0x6b0] sm:$0xff]  ;;  %v263_v40 = vld [vmem:[#allocation5 + $0x678] sm:$0xff] }
  0xfb   :  { %1121 = vmatprep.subr.mxu1 %v383_v41  ;;  %1051 = vmatpush1.msra.mxu0 %v126_v42  ;;  %v526_v39 = vld [vmem:[#allocation5 + $0xeb0] sm:$0xff]  ;;  %v519_v41 = vld [vmem:[#allocation5 + $0xe78] sm:$0xff] }
  0xfc   :  { %1122 = vmatpush1.msra.mxu1 %v382_v43  ;;  %1052 = vmatprep.subr.mxu0 %v119_v44  ;;  %v262_v42 = vld [vmem:[#allocation5 + $0x670] sm:$0xff]  ;;  %v255_v44 = vld [vmem:[#allocation5 + $0x638] sm:$0xff] }
  0xfd   :  { %1123 = vmatprep.subr.mxu1 %v375_v45  ;;  %1053 = vmatpush1.msra.mxu0 %v118_v46  ;;  %v518_v43 = vld [vmem:[#allocation5 + $0xe70] sm:$0xff]  ;;  %v511_v45 = vld [vmem:[#allocation5 + $0xe38] sm:$0xff]  ;;  %v570_v46 = vlaneseq }
  0xfe   :  { %1124 = vmatpush1.msra.mxu1 %v374_v47  ;;  %1054 = vmatprep.subr.mxu0 %v111_v48  ;;  %v254_v47 = vld [vmem:[#allocation5 + $0x630] sm:$0xff] }
  0xff   :  { %1125 = vmatprep.subr.mxu1 %v367_v49  ;;  %1055 = vmatpush1.msra.mxu0 %v110_v50  ;;  %v510_v48 = vld [vmem:[#allocation5 + $0xe30] sm:$0xff]  ;;  %v247_v49 = vld [vmem:[#allocation5 + $0x5f8] sm:$0xff] }
 0x100   :  { %1126 = vmatpush1.msra.mxu1 %v366_v51  ;;  %1056 = vmatprep.subr.mxu0 %v103_v52  ;;  %v503_v50 = vld [vmem:[#allocation5 + $0xdf8] sm:$0xff]  ;;  %v246_v51 = vld [vmem:[#allocation5 + $0x5f0] sm:$0xff] }
 0x101   :  { %1127 = vmatprep.subr.mxu1 %v359_v53  ;;  %1057 = vmatpush1.msra.mxu0 %v102_v54  ;;  %v502_v52 = vld [vmem:[#allocation5 + $0xdf0] sm:$0xff]  ;;  %v239_v53 = vld [vmem:[#allocation5 + $0x5b8] sm:$0xff] }
 0x102   :  { %1128 = vmatpush1.msra.mxu1 %v358_v55  ;;  %1058 = vmatprep.subr.mxu0 %v95_v56  ;;  %v495_v54 = vld [vmem:[#allocation5 + $0xdb8] sm:$0xff]  ;;  %v1361_v55 = vshrl.u32 %v570_v46, 7  ;;  %v238_v56 = vld [vmem:[#allocation5 + $0x5b0] sm:$0xff] }
 0x103   :  { %1129 = vmatprep.subr.mxu1 %v351_v57  ;;  %1059 = vmatpush1.msra.mxu0 %v94_v58  ;;  %v494_v57 = vld [vmem:[#allocation5 + $0xdb0] sm:$0xff]  ;;  %v231_v58 = vld [vmem:[#allocation5 + $0x578] sm:$0xff] }
 0x104   :  { %1130 = vmatpush1.msra.mxu1 %v350_v59  ;;  %1060 = vmatprep.subr.mxu0 %v87_v60  ;;  %v487_v59 = vld [vmem:[#allocation5 + $0xd78] sm:$0xff]  ;;  %v230_v60 = vld [vmem:[#allocation5 + $0x570] sm:$0xff] }
 0x105   :  { %1131 = vmatprep.subr.mxu1 %v343_v61  ;;  %1061 = vmatpush1.msra.mxu0 %v86_v62  ;;  %v486_v61 = vld [vmem:[#allocation5 + $0xd70] sm:$0xff]  ;;  %v223_v62 = vld [vmem:[#allocation5 + $0x538] sm:$0xff] }
 0x106   :  { %1132 = vmatpush1.msra.mxu1 %v342_v0  ;;  %1062 = vmatprep.subr.mxu0 %v79_v3  ;;  %v479_v0 = vld [vmem:[#allocation5 + $0xd38] sm:$0xff]  ;;  %v572_v3 = vsub.s32 0, %v1361_v55 }
 0x107   :  { %1133 = vmatprep.subr.mxu1 %v335_v4  ;;  %1063 = vmatpush1.msra.mxu0 %v78_v6  ;;  %v222_v4 = vld [vmem:[#allocation5 + $0x530] sm:$0xff] }
 0x108   :  { %1134 = vmatpush1.msra.mxu1 %v334_v7  ;;  %1064 = vmatprep.subr.mxu0 %v71_v8  ;;  %v478_v6 = vld [vmem:[#allocation5 + $0xd30] sm:$0xff]  ;;  %v1364_v7 = vld [vmem:[#allocation7] sm:$0xff]  ;;  %v215_v8 = vld [vmem:[#allocation5 + $0x4f8] sm:$0xff] }
 0x109   :  { %1135 = vmatprep.subr.mxu1 %v327_v9  ;;  %1065 = vmatpush1.msra.mxu0 %v70_v10  ;;  %v471_v9 = vld [vmem:[#allocation5 + $0xcf8] sm:$0xff]  ;;  %v576_v10 = vsub.s32 1, %v1361_v55 }
 0x10a   :  { %1136 = vmatpush1.msra.mxu1 %v326_v11  ;;  %1066 = vmatprep.subr.mxu0 %v63_v12  ;;  %v214_v11 = vld [vmem:[#allocation5 + $0x4f0] sm:$0xff] }
 0x10b   :  { %1137 = vmatprep.subr.mxu1 %v319_v14  ;;  %1067 = vmatpush1.msra.mxu0 %v62_v16  ;;  %v470_v12 = vld [vmem:[#allocation5 + $0xcf0] sm:$0xff]  ;;  %v207_v14 = vld [vmem:[#allocation5 + $0x4b8] sm:$0xff] }
 0x10c   :  { %1138 = vmatpush1.msra.mxu1 %v318_v17  ;;  %1068 = vmatprep.subr.mxu0 %v311_v19  ;;  %v463_v16 = vld [vmem:[#allocation5 + $0xcb8] sm:$0xff]  ;;  %v573_v17 = vrot.slane %v1364_v7, %v572_v3  ;;  %v206_v19 = vld [vmem:[#allocation5 + $0x4b0] sm:$0xff] }
 0x10d   :  { %1139 = vmatprep.subr.mxu1 %v567_v20  ;;  %1069 = vmatpush2.msra.mxu0 %v310_v21  ;;  %v462_v20 = vld [vmem:[#allocation5 + $0xcb0] sm:$0xff]  ;;  %v199_v21 = vld [vmem:[#allocation5 + $0x478] sm:$0xff] }
 0x10e   :  { %1140 = vmatpush2.msra.mxu1 %v566_v1  ;;  %1070 = vmatprep.subr.mxu0 %v303_v22  ;;  %v455_v1 = vld [vmem:[#allocation5 + $0xc78] sm:$0xff]  ;;  %v577_v22 = vrot.slane %v1364_v7, %v576_v10 }
 0x10f   :  { %1141 = vmatprep.subr.mxu1 %v559_v2  ;;  %1071 = vmatpush2.msra.mxu0 %v302_v23  ;;  %v198_v2 = vld [vmem:[#allocation5 + $0x470] sm:$0xff] }
 0x110   :  { %1142 = vmatpush2.msra.mxu1 %v558_v24  ;;  %1072 = vmatprep.subr.mxu0 %v295_v5  ;;  %v454_v23 = vld [vmem:[#allocation5 + $0xc70] sm:$0xff]  ;;  %v191_v5 = vld [vmem:[#allocation5 + $0x438] sm:$0xff] }
 0x111   :  { %1143 = vmatprep.subr.mxu1 %v551_v25  ;;  %1073 = vmatpush2.msra.mxu0 %v294_v26  ;;  %v447_v25 = vld [vmem:[#allocation5 + $0xc38] sm:$0xff] }
 0x112   :  { %1144 = vmatpush2.msra.mxu1 %v550_v27  ;;  %1074 = vmatprep.subr.mxu0 %v287_v28  ;;  %v190_v27 = vld [vmem:[#allocation5 + $0x430] sm:$0xff] }
 0x113   :  { %1145 = vmatprep.subr.mxu1 %v543_v29  ;;  %1075 = vmatpush2.msra.mxu0 %v286_v30  ;;  %v446_v30 = vld [vmem:[#allocation5 + $0xc30] sm:$0xff] }
 0x114   :  { %1146 = vmatpush2.msra.mxu1 %v542_v31  ;;  %1076 = vmatprep.subr.mxu0 %v279_v32 }
 0x115   :  { %1147 = vmatprep.subr.mxu1 %v535_v33  ;;  %1077 = vmatpush2.msra.mxu0 %v278_v34 }
 0x116   :  { %1148 = vmatpush2.msra.mxu1 %v534_v35  ;;  %1078 = vmatprep.subr.mxu0 %v271_v36  ;;  %v580_v35 = vsub.s32 2, %v1361_v55  ;;  %v584_v36 = vsub.s32 3, %v1361_v55 }
 0x117   :  { %1149 = vmatprep.subr.mxu1 %v527_v37  ;;  %1079 = vmatpush2.msra.mxu0 %v270_v38 }
 0x118   :  { %1150 = vmatpush2.msra.mxu1 %v526_v39  ;;  %1080 = vmatprep.subr.mxu0 %v263_v40  ;;  %v581_v37 = vrot.slane %v1364_v7, %v580_v35  ;;  %v585_v38 = vrot.slane %v1364_v7, %v584_v36 }
 0x119   :  { %1151 = vmatprep.subr.mxu1 %v519_v41  ;;  %1081 = vmatpush2.msra.mxu0 %v262_v42 }
 0x11a   :  { %1152 = vmatpush2.msra.mxu1 %v518_v43  ;;  %1082 = vmatprep.subr.mxu0 %v255_v44  ;;  %v592_v44 = vsub.s32 5, %v1361_v55 }
 0x11b   :  { %1153 = vmatprep.subr.mxu1 %v511_v45  ;;  %1083 = vmatpush2.msra.mxu0 %v254_v47 }
 0x11c   :  { %1154 = vmatpush2.msra.mxu1 %v510_v48  ;;  %1084 = vmatprep.subr.mxu0 %v247_v49  ;;  %v593_v46 = vrot.slane %v1364_v7, %v592_v44 }
 0x11d   :  { %1155 = vmatprep.subr.mxu1 %v503_v50  ;;  %1085 = vmatpush2.msra.mxu0 %v246_v51 }
 0x11e   :  { %1156 = vmatpush2.msra.mxu1 %v502_v52  ;;  %1086 = vmatprep.subr.mxu0 %v239_v53 }
 0x11f   :  { %1157 = vmatprep.subr.mxu1 %v495_v54  ;;  %1087 = vmatpush2.msra.mxu0 %v238_v56  ;;  %v596_v56 = vsub.s32 6, %v1361_v55 }
 0x120   :  { %1158 = vmatpush2.msra.mxu1 %v494_v57  ;;  %1088 = vmatprep.subr.mxu0 %v231_v58  ;;  %v600_v57 = vsub.s32 7, %v1361_v55 }
 0x121   :  { %1159 = vmatprep.subr.mxu1 %v487_v59  ;;  %1089 = vmatpush2.msra.mxu0 %v230_v60  ;;  %v597_v58 = vrot.slane %v1364_v7, %v596_v56 }
 0x122   :  { %1160 = vmatpush2.msra.mxu1 %v486_v61  ;;  %1090 = vmatprep.subr.mxu0 %v223_v62  ;;  %v601_v59 = vrot.slane %v1364_v7, %v600_v57 }
 0x123   :  { %1161 = vmatprep.subr.mxu1 %v479_v0  ;;  %1091 = vmatpush2.msra.mxu0 %v222_v4 }
 0x124   :  { %1162 = vmatpush2.msra.mxu1 %v478_v6  ;;  %1092 = vmatprep.subr.mxu0 %v215_v8 }
 0x125   :  { %1163 = vmatprep.subr.mxu1 %v471_v9  ;;  %1093 = vmatpush2.msra.mxu0 %v214_v11 }
 0x126   :  { %1164 = vmatpush2.msra.mxu1 %v470_v12  ;;  %1094 = vmatprep.subr.mxu0 %v207_v14 }
 0x127   :  { %1165 = vmatprep.subr.mxu1 %v463_v16  ;;  %v676_v24 = vpop.f32.mrf.mxu0  ;;  %1095 = vmatpush2.msra.mxu0 %v206_v19 }
 0x128   :  { %1166 = vmatpush2.msra.mxu1 %v462_v20  ;;  %v677_v26 = vadd.f32 %v676_v24, %v573_v17  ;;  %1096 = vmatprep.subr.mxu0 %v199_v21 }
 0x129   :  { %1167 = vmatprep.subr.mxu1 %v455_v1  ;;  %v747_v28 = vpop.f32.mrf.mxu1  ;;  %v678_v29 = vpop.f32.mrf.mxu0  ;;  %1097 = vmatpush2.msra.mxu0 %v198_v2 }
 0x12a   :  { %1168 = vmatpush2.msra.mxu1 %v454_v23  ;;  %v748_v31 = vadd.f32 %v747_v28, %v677_v26  ;;  %v679_v32 = vadd.f32 %v678_v29, %v577_v22  ;;  %1098 = vmatprep.subr.mxu0 %v191_v5 }
 0x12b   :  { %1169 = vmatprep.subr.mxu1 %v447_v25  ;;  %v749_v33 = vpop.f32.mrf.mxu1  ;;  %1099 = vmatpush2.msra.mxu0 %v190_v27 }
 0x12c   :  { %1100 = vmatprep.mubr.f32.mxu0 %v1349_v13  ;;  %1178 = vst [vmem:[#allocation8] sm:$0xff] %v748_v31  ;;  %v750_v34 = vadd.f32 %v749_v33, %v679_v32  ;;  %1170 = vmatpush2.msra.mxu1 %v446_v30 }
 0x12d   :  { %1171 = vmatprep.mubr.f32.mxu1 %v1355_v18  ;;  %1101 = vmatmul.mubr.f32.vlgmr.msra.gmra.mxu0 %v1352_v15 }
 0x12e   :  { %1172 = vmatmul.mubr.f32.vlgmr.msra.gmra.mxu1 %v1358_v63  ;;  %1179 = vst [vmem:[#allocation8 + $0x8] sm:$0xff] %v750_v34  ;;  %v588_v63 = vsub.s32 4, %v1361_v55 }
 0x130   :  { %v589_v45 = vrot.slane %v1364_v7, %v588_v63 }
 0x169   :  { %v818_v39 = vpop.f32.mrf.mxu0 }
 0x16a   :  { %v819_v13 = vadd.f32 %v818_v39, %v581_v37 }
 0x16b   :  { %v889_v40 = vpop.f32.mrf.mxu1  ;;  %v820_v41 = vpop.f32.mrf.mxu0 }
 0x16c   :  { %v890_v42 = vadd.f32 %v889_v40, %v819_v13  ;;  %v821_v43 = vadd.f32 %v820_v41, %v585_v38 }
 0x16d   :  { %v891_v18 = vpop.f32.mrf.mxu1 }
 0x16e   :  { %1180 = vst [vmem:[#allocation8 + $0x10] sm:$0xff] %v890_v42  ;;  %v892_v15 = vadd.f32 %v891_v18, %v821_v43 }
 0x170   :  { %1181 = vst [vmem:[#allocation8 + $0x18] sm:$0xff] %v892_v15 }
 0x1ab   :  { %v960_v47 = vpop.f32.mrf.mxu0 }
 0x1ac   :  { %v961_v48 = vadd.f32 %v960_v47, %v589_v45 }
 0x1ad   :  { %v1031_v49 = vpop.f32.mrf.mxu1  ;;  %v962_v50 = vpop.f32.mrf.mxu0 }
 0x1ae   :  { %v1032_v51 = vadd.f32 %v1031_v49, %v961_v48  ;;  %v963_v52 = vadd.f32 %v962_v50, %v593_v46 }
 0x1af   :  { %v1033_v53 = vpop.f32.mrf.mxu1 }
 0x1b0   :  { %1182 = vst [vmem:[#allocation8 + $0x20] sm:$0xff] %v1032_v51  ;;  %v1034_v54 = vadd.f32 %v1033_v53, %v963_v52 }
 0x1b2   :  { %1183 = vst [vmem:[#allocation8 + $0x28] sm:$0xff] %v1034_v54 }
 0x1ed   :  { %v1102_v60 = vpop.f32.mrf.mxu0 }
 0x1ee   :  { %v1173_v61 = vpop.f32.mrf.mxu1  ;;  %v1103_v62 = vadd.f32 %v1102_v60, %v597_v58 }
 0x1ef   :  { %v1104_v0 = vpop.f32.mrf.mxu0 }
 0x1f0   :  { %v1174_v3 = vadd.f32 %v1173_v61, %v1103_v62  ;;  %v1105_v4 = vadd.f32 %v1104_v0, %v601_v59  ;;  %v1175_v6 = vpop.f32.mrf.mxu1 }
 0x1f2   :  { %1184 = vst [vmem:[#allocation8 + $0x30] sm:$0xff] %v1174_v3  ;;  %v1176_v8 = vadd.f32 %v1175_v6, %v1105_v4 }
 0x1f4   :  { %1185 = vst [vmem:[#allocation8 + $0x38] sm:$0xff] %v1176_v8 }
 0x1f5   :  { %1283 = shalt.err (!%p1280_p5)
}
 0x1f6   :  { %1195 = dma.vmem_to_hbm [thread:$0]  %s1193_s2, 1024, %s1391_s3, [#allocation4]  }
 0x1f7   :  { %1296 = dma.done.wait [#allocation4], 1024  }
 0x1f8   :  { %1297 = vsyncadd [#allocation4], 4294966272 }
 0x1f9   :  { %1199 = vsyncpa [#allocation3], 1 }
 0x1fa   :  { %1200 = vsyncpa [#allocation6], 1 }
 0x1fb   :  { %1201 = vsyncpa [#allocation4], 1 }

</bundles_post_ra>
